<compile_context>
chip_gen: v6e
topology: v6e:2x2x1
jax: 0.10.0
libtpu: 0.0.40
codegen_flags: <defaults>
</compile_context>

<pallas_src>
import functools

import jax
import jax.numpy as jnp
from jax.experimental import pallas as pl
from jax.experimental.pallas import tpu as pltpu


# ----------------------------------------------------------------------------
# Hardware-aware configuration
# ----------------------------------------------------------------------------

def _vmem_capacity():
    try:
        info = pltpu.get_tpu_info()
        cap = getattr(info, "vmem_capacity_bytes", None)
        if cap:
            return int(cap)
    except Exception:
        pass
    return 64 * 1024 * 1024  # conservative default (v7x per-TensorCore)


_VMEM_CAP = _vmem_capacity()
# ~85% of physical per-core VMEM: ~109 MiB on v5e/v6e (128 MiB), ~54 MiB on v7x.
_VMEM_LIMIT = min(int(_VMEM_CAP * 0.85), 112 * 1024 * 1024)


def _row_tile(n, d):
    """Largest row tile that divides n and keeps activation tiles inside budget."""
    budget = _VMEM_CAP // 4
    for t in (512, 256, 128):
        if n % t == 0 and t * d * 20 <= budget:
            return t
    for t in (512, 256, 128):
        if n % t == 0:
            return t
    return n


def _seq_tile(t):
    for c in (256, 128):
        if t % c == 0:
            return c
    return t


def _col_tile(v):
    for c in (2048, 1024, 512, 384, 256, 128):
        if v % c == 0:
            return c
    return v


def _hidden_tile(d4, d):
    """MLP hidden-dim K tile: streamed W_fc/W_proj blocks stay inside budget."""
    budget = _VMEM_CAP // 4
    for c in (2048, 1024, 512, 256, 128):
        if d4 % c == 0 and 8 * d * c <= budget:
            return c
    for c in (2048, 1024, 512, 256, 128):
        if d4 % c == 0:
            return c
    return d4


def _buffered(block_shape, index_map, buffers):
    """BlockSpec with an explicit pipeline buffer count (fallback if unsupported)."""
    if buffers is not None and hasattr(pl, "Buffered"):
        try:
            return pl.BlockSpec(block_shape, index_map,
                                pipeline_mode=pl.Buffered(buffers))
        except TypeError:
            pass
    return pl.BlockSpec(block_shape, index_map)


# ----------------------------------------------------------------------------
# Pallas kernels
# ----------------------------------------------------------------------------

def _layernorm(x, gamma, beta, eps=1e-5):
    mu = jnp.mean(x, axis=-1, keepdims=True)
    var = jnp.mean((x - mu) ** 2, axis=-1, keepdims=True)
    return (x - mu) * jax.lax.rsqrt(var + eps) * gamma + beta


def ln_qkv_kernel(x_ref, g_ref, b_ref, w_ref, o_ref, xn_sc):
    """One head's Q/K/V projection of LayerNorm(x) for one row tile.

    x_ref: (rn, d) f32   g/b: (1, d)   w_ref: (d, hd) bf16   o_ref: (rn, hd) bf16
    xn_sc: (rn, d) bf16 LN cache, reused across the 3H column steps.
    """
    @pl.when(pl.program_id(1) == 0)
    def _():
        xn_sc[...] = _layernorm(x_ref[...], g_ref[...], b_ref[...]
                                ).astype(jnp.bfloat16)
    o_ref[...] = jnp.dot(xn_sc[...], w_ref[...],
                         preferred_element_type=jnp.float32).astype(o_ref.dtype)


def ln_matmul_kernel(x_ref, g_ref, b_ref, w_ref, o_ref, xn_sc):
    """y = LayerNorm(x) @ W for one (row_tile, col_tile) output block (LM head)."""
    @pl.when(pl.program_id(1) == 0)
    def _():
        xn_sc[...] = _layernorm(x_ref[...], g_ref[...], b_ref[...]
                                ).astype(jnp.bfloat16)
    o_ref[...] = jnp.dot(xn_sc[...], w_ref[...],
                         preferred_element_type=jnp.float32).astype(o_ref.dtype)


def flash_attn_kernel(q_ref, k_ref, v_ref, o_ref, m_sc, l_sc, acc_sc):
    """Causal flash attention for one (head, batch, q_tile) over kv tiles.

    q_ref: (tq, hd) bf16  k/v_ref: (tk, hd) bf16  o_ref: (tq, hd) bf16
    scratch: m/l (tq, 1) f32, acc (tq, hd) f32 — resident across the kv axis.
    The 1/sqrt(hd) scale is already folded into the Q projection weights.
    """
    qi = pl.program_id(2)
    ki = pl.program_id(3)
    tq = q_ref.shape[0]
    tk = k_ref.shape[0]

    @pl.when(ki == 0)
    def _():
        m_sc[...] = jnp.full_like(m_sc, -jnp.inf)
        l_sc[...] = jnp.zeros_like(l_sc)
        acc_sc[...] = jnp.zeros_like(acc_sc)

    q_end = qi * tq + tq - 1      # last global query row in this tile
    k_start = ki * tk             # first global key column in this tile

    @pl.when(k_start <= q_end)    # skip fully-masked (above-diagonal) kv tiles
    def _():
        s = jax.lax.dot_general(q_ref[...], k_ref[...], (((1,), (1,)), ((), ())),
                                preferred_element_type=jnp.float32)  # (tq, tk)
        row = qi * tq + jax.lax.broadcasted_iota(jnp.int32, (tq, tk), 0)
        col = k_start + jax.lax.broadcasted_iota(jnp.int32, (tq, tk), 1)
        s = jnp.where(col <= row, s, -1e30)   # only bites on the diagonal tile

        m_prev = m_sc[...]
        m_new = jnp.maximum(m_prev, jnp.max(s, axis=-1, keepdims=True))
        alpha = jnp.exp(m_prev - m_new)
        p = jnp.exp(s - m_new)
        l_sc[...] = alpha * l_sc[...] + jnp.sum(p, axis=-1, keepdims=True)
        acc_sc[...] = alpha * acc_sc[...] + jnp.dot(
            p.astype(v_ref.dtype), v_ref[...], preferred_element_type=jnp.float32)
        m_sc[...] = m_new

    @pl.when(ki == pl.num_programs(3) - 1)
    def _():
        o_ref[...] = (acc_sc[...] * pl.reciprocal(l_sc[...], approx=True)
                      ).astype(o_ref.dtype)


def post_attn_mlp_kernel(x_ref, a_ref, w_o_ref, g2_ref, b2_ref,
                         w_fc_ref, w_pr_ref, o_ref,
                         xres_sc, xn_sc, acc_sc):
    """x = x + sum_h attn_h @ W_o[h];  x = x + W_proj(gelu(W_fc(LN2(x)))).

    Grid: (row_tiles, hidden_k_tiles).  Per-head out-projection + LN2 run once
    at k==0 (cached in scratch); the MLP streams W_fc/W_proj K tiles and
    accumulates into an f32 (rn, d) accumulator, finalized on the last k step.
    """
    k = pl.program_id(1)
    num_heads = a_ref.shape[0]

    @pl.when(k == 0)
    def _():
        x = x_ref[...]
        for h in range(num_heads):   # per-head out-proj: no head-merge transpose
            x = x + jnp.dot(a_ref[h], w_o_ref[h],
                            preferred_element_type=jnp.float32)
        xres_sc[...] = x
        xn_sc[...] = _layernorm(x, g2_ref[...], b2_ref[...]).astype(jnp.bfloat16)
        acc_sc[...] = jnp.zeros_like(acc_sc)

    h_blk = jnp.dot(xn_sc[...], w_fc_ref[...],
                    preferred_element_type=jnp.float32)          # (rn, tkh) f32
    h_blk = jax.nn.gelu(h_blk, approximate=True)
    acc_sc[...] = acc_sc[...] + jnp.dot(h_blk.astype(jnp.bfloat16), w_pr_ref[...],
                                        preferred_element_type=jnp.float32)

    @pl.when(k == pl.num_programs(1) - 1)
    def _():
        o_ref[...] = xres_sc[...] + acc_sc[...]


# ----------------------------------------------------------------------------
# pallas_call wrappers
# ----------------------------------------------------------------------------

def run_ln_qkv(x2d, g, b, w_qkv):
    """LN1 + QKV projection, head-major output (3H, N, hd) bf16."""
    n, d = x2d.shape
    n_cols, _, hd = w_qkv.shape                      # (3H, d, hd)
    rn = _row_tile(n, d)
    return pl.pallas_call(
        ln_qkv_kernel,
        out_shape=jax.ShapeDtypeStruct((n_cols, n, hd), jnp.bfloat16),
        grid=(n // rn, n_cols),
        in_specs=[
            pl.BlockSpec((rn, d), lambda i, j: (i, 0)),
            _buffered((1, d), lambda i, j: (0, 0), 1),
            _buffered((1, d), lambda i, j: (0, 0), 1),
            pl.BlockSpec((None, d, hd), lambda i, j: (j, 0, 0)),   # streamed weight
        ],
        out_specs=pl.BlockSpec((None, rn, hd), lambda i, j: (j, i, 0)),
        scratch_shapes=[pltpu.VMEM((rn, d), jnp.bfloat16)],
        compiler_params=pltpu.CompilerParams(
            dimension_semantics=("parallel", "arbitrary"),
            vmem_limit_bytes=_VMEM_LIMIT),
    )(x2d, g, b, w_qkv)


def run_attention(qkv):
    """qkv: (3, H, B, T, hd) bf16 -> causal attention output (H, B, T, hd) bf16."""
    _, H, B, T, hd = qkv.shape
    tq = _seq_tile(T)
    tk = tq
    return pl.pallas_call(
        flash_attn_kernel,
        out_shape=jax.ShapeDtypeStruct((H, B, T, hd), jnp.bfloat16),
        grid=(H, B, T // tq, T // tk),
        in_specs=[
            pl.BlockSpec((None, None, None, tq, hd),
                         lambda h, b, qi, ki: (0, h, b, qi, 0)),
            pl.BlockSpec((None, None, None, tk, hd),
                         lambda h, b, qi, ki: (1, h, b, ki, 0)),
            pl.BlockSpec((None, None, None, tk, hd),
                         lambda h, b, qi, ki: (2, h, b, ki, 0)),
        ],
        out_specs=pl.BlockSpec((None, None, tq, hd),
                               lambda h, b, qi, ki: (h, b, qi, 0)),
        scratch_shapes=[pltpu.VMEM((tq, 1), jnp.float32),
                        pltpu.VMEM((tq, 1), jnp.float32),
                        pltpu.VMEM((tq, hd), jnp.float32)],
        compiler_params=pltpu.CompilerParams(
            dimension_semantics=("parallel", "parallel", "parallel", "arbitrary"),
            vmem_limit_bytes=_VMEM_LIMIT),
    )(qkv, qkv, qkv)


def run_post_block(x2d, attn, bp):
    """Out-projection + residual + LN2 + K-tiled MLP + residual, row-tiled."""
    n, d = x2d.shape
    H, _, hd = attn.shape
    d4 = bp["w_fc"].shape[1]
    rn = _row_tile(n, d)
    tkh = _hidden_tile(d4, d)
    return pl.pallas_call(
        post_attn_mlp_kernel,
        out_shape=jax.ShapeDtypeStruct((n, d), jnp.float32),
        grid=(n // rn, d4 // tkh),
        in_specs=[
            pl.BlockSpec((rn, d), lambda i, k: (i, 0)),            # x (f32)
            pl.BlockSpec((H, rn, hd), lambda i, k: (0, i, 0)),     # attn, head-major
            _buffered((H, hd, d), lambda i, k: (0, 0, 0), 1),      # W_o (resident)
            _buffered((1, d), lambda i, k: (0, 0), 1),             # ln2 gamma
            _buffered((1, d), lambda i, k: (0, 0), 1),             # ln2 beta
            pl.BlockSpec((d, tkh), lambda i, k: (0, k)),           # W_fc (streamed)
            pl.BlockSpec((tkh, d), lambda i, k: (k, 0)),           # W_proj (streamed)
        ],
        out_specs=pl.BlockSpec((rn, d), lambda i, k: (i, 0)),
        scratch_shapes=[pltpu.VMEM((rn, d), jnp.float32),   # post-attn residual
                        pltpu.VMEM((rn, d), jnp.bfloat16),  # LN2 cache
                        pltpu.VMEM((rn, d), jnp.float32)],  # MLP accumulator
        compiler_params=pltpu.CompilerParams(
            dimension_semantics=("parallel", "arbitrary"),
            vmem_limit_bytes=_VMEM_LIMIT),
    )(x2d, attn, bp["w_o"], bp["ln2_g"], bp["ln2_b"], bp["w_fc"], bp["w_proj"])


def run_ln_matmul(x2d, g, b, w, out_dtype, col_tile=None, weight_buffers=None):
    """y = LayerNorm(x) @ W, column-tiled over the output dim (LM head)."""
    n, d_in = x2d.shape
    d_out = w.shape[1]
    rn = _row_tile(n, d_in)
    tc = col_tile if col_tile else d_out
    n_cols = d_out // tc
    wb = min(weight_buffers, max(n_cols, 1)) if weight_buffers else None
    return pl.pallas_call(
        ln_matmul_kernel,
        out_shape=jax.ShapeDtypeStruct((n, d_out), out_dtype),
        grid=(n // rn, n_cols),
        in_specs=[
            pl.BlockSpec((rn, d_in), lambda i, j: (i, 0)),
            _buffered((1, d_in), lambda i, j: (0, 0), 1),
            _buffered((1, d_in), lambda i, j: (0, 0), 1),
            _buffered((d_in, tc), lambda i, j: (0, j), wb),  # deep-buffered stream
        ],
        out_specs=pl.BlockSpec((rn, tc), lambda i, j: (i, j)),
        scratch_shapes=[pltpu.VMEM((rn, d_in), jnp.bfloat16)],
        compiler_params=pltpu.CompilerParams(
            dimension_semantics=("parallel", "arbitrary"),
            vmem_limit_bytes=_VMEM_LIMIT),
    )(x2d, g, b, w)


# ----------------------------------------------------------------------------
# Forward pass (semantics of GPT.forward with kv_cache=None, eval mode)
# ----------------------------------------------------------------------------

def gpt_forward(idx, params, H):
    B, T = idx.shape
    d = params["wte"].shape[1]
    hd = d // H
    N = B * T

    tok_emb = jnp.take(params["wte"], idx, axis=0)          # (B, T, d) f32
    pos_emb = params["wpe"][:T]                              # (T, d)
    x = (tok_emb + pos_emb[None, :, :]).reshape(N, d)        # f32 residual stream

    for bp in params["blocks"]:
        # LN1 + QKV projection directly in head-major layout (no XLA transposes).
        qkv = run_ln_qkv(x, bp["ln1_g"], bp["ln1_b"], bp["w_qkv"])  # (3H, N, hd)
        qkv = qkv.reshape(3, H, B, T, hd)                           # free reshape

        # Causal flash attention over (head, batch, q_tile, kv_tile).
        attn = run_attention(qkv)                                   # (H, B, T, hd)
        attn = attn.reshape(H, N, hd)                               # free reshape

        # Per-head out-proj + residual + LN2 + K-tiled MLP + residual.
        x = run_post_block(x, attn, bp)                             # (N, d) f32

    x_last = x.reshape(B, T, d)[:, -1]                              # (B, d)
    logits = run_ln_matmul(x_last, params["ln_f_g"], params["ln_f_b"],
                           params["w_head"], jnp.float32,
                           col_tile=_col_tile(params["w_head"].shape[1]),
                           weight_buffers=3)
    return logits                                                   # (B, V) f32


# ----------------------------------------------------------------------------
# Deterministic parameter construction (synthetic, no checkpoint)
# ----------------------------------------------------------------------------

def make_params(key, d, H, T, V, layers):
    hd = d // H

    def nrm(k, shape, std=0.02, dtype=jnp.float32):
        return (std * jax.random.normal(k, shape)).astype(dtype)

    keys = jax.random.split(key, 4 + 4 * layers)
    params = {
        "wte": nrm(keys[0], (V, d)),                     # embeddings in f32
        "wpe": nrm(keys[1], (T, d)),
        "ln_f_g": jnp.ones((1, d), jnp.float32),
        "ln_f_b": jnp.zeros((1, d), jnp.float32),
        "w_head": nrm(keys[2], (d, V), dtype=jnp.bfloat16),  # nn.Linear(d,V).weight.T
        "blocks": [],
    }
    for i in range(layers):
        k0, k1, k2, k3 = keys[4 + 4 * i: 8 + 4 * i]
        # QKV weight stored head-major: (3H, d, hd); index j = part*H + head,
        # equivalent to nn.Linear(d,3d).weight.T reshaped (done once at load time).
        w_qkv = nrm(k0, (3 * H, d, hd))
        # Fold the 1/sqrt(hd) attention scale into the Q projection (zero runtime cost).
        w_qkv = w_qkv.at[:H].multiply(1.0 / (hd ** 0.5)).astype(jnp.bfloat16)
        params["blocks"].append({
            "ln1_g": jnp.ones((1, d), jnp.float32),
            "ln1_b": jnp.zeros((1, d), jnp.float32),
            "w_qkv": w_qkv,
            # Out-projection nn.Linear(d,d).weight.T, rows head-major -> (H, hd, d).
            "w_o": nrm(k1, (H, hd, d), dtype=jnp.bfloat16),
            "ln2_g": jnp.ones((1, d), jnp.float32),
            "ln2_b": jnp.zeros((1, d), jnp.float32),
            "w_fc": nrm(k2, (d, 4 * d), dtype=jnp.bfloat16),
            "w_proj": nrm(k3, (4 * d, d), dtype=jnp.bfloat16),
        })
    return params


# ----------------------------------------------------------------------------
# Main
# ----------------------------------------------------------------------------

if __name__ == "__main__":
    # small GPT config:  d=32, H=4, T=8, V=64, layers=2, batch=2
    d, H, T, V, layers = 32, 4, 8, 64, 2
    B = 2

    key = jax.random.PRNGKey(0)
    k_idx, k_params = jax.random.split(key)

    idx = jax.random.randint(k_idx, (B, T), 0, V, dtype=jnp.int32)
    params = make_params(k_params, d, H, T, V, layers)

    fwd = jax.jit(functools.partial(gpt_forward, H=H))
    logits = jax.block_until_ready(fwd(idx, params))

    assert logits.shape == (B, V), logits.shape
    assert logits.dtype == jnp.float32
    assert bool(jnp.all(jnp.isfinite(logits)))
    print("KERNEL_OK")
</pallas_src>

<mosaic_0001>
module attributes {stable_mosaic.version = 11 : i64} {
  func.func @ln_qkv_kernel(%arg0: i32, %arg1: i32, %arg2: memref<16x32xf32, #tpu.memory_space<vmem>>, %arg3: memref<1x32xf32, #tpu.memory_space<vmem>>, %arg4: memref<1x32xf32, #tpu.memory_space<vmem>>, %arg5: memref<1x32x8xbf16, #tpu.memory_space<vmem>>, %arg6: memref<1x16x8xbf16, #tpu.memory_space<vmem>>, %arg7: memref<16x32xbf16, #tpu.memory_space<vmem>>) attributes {dimension_semantics = [#tpu.dimension_semantics<parallel>, #tpu.dimension_semantics<arbitrary>], iteration_bounds = array<i64: 1, 12>, scalar_prefetch = 0 : i64, scratch_operands = 1 : i64, tpu.core_type = #tpu.core_type<tc>, window_params = [{transform_indices = @transform_0, window_bounds = array<i64: 16, 32>}, {pipeline_mode = #tpu.pipeline_mode<synchronous>, transform_indices = @transform_1, window_bounds = array<i64: 1, 32>}, {pipeline_mode = #tpu.pipeline_mode<synchronous>, transform_indices = @transform_2, window_bounds = array<i64: 1, 32>}, {transform_indices = @transform_3, window_bounds = array<i64: 1, 32, 8>}, {transform_indices = @transform_4, window_bounds = array<i64: 1, 16, 8>}]} {
    %c0_i32 = arith.constant 0 : i32
    %0 = arith.cmpi eq, %arg1, %c0_i32 : i32
    %1 = arith.extui %0 : i1 to i32
    %c0_i32_0 = arith.constant 0 : i32
    %2 = arith.cmpi ne, %1, %c0_i32_0 : i32
    scf.if %2 {
      %c0_8 = arith.constant 0 : index
      %c0_9 = arith.constant 0 : index
      %11 = vector.load %arg2[%c0_8, %c0_9] : memref<16x32xf32, #tpu.memory_space<vmem>>, vector<16x32xf32>
      %c0_10 = arith.constant 0 : index
      %c0_11 = arith.constant 0 : index
      %12 = vector.load %arg3[%c0_10, %c0_11] : memref<1x32xf32, #tpu.memory_space<vmem>>, vector<1x32xf32>
      %c0_12 = arith.constant 0 : index
      %c0_13 = arith.constant 0 : index
      %13 = vector.load %arg4[%c0_12, %c0_13] : memref<1x32xf32, #tpu.memory_space<vmem>>, vector<1x32xf32>
      %cst_14 = arith.constant dense<0.000000e+00> : vector<16xf32>
      %14 = vector.multi_reduction <add>, %11, %cst_14 [1] : vector<16x32xf32> to vector<16xf32>
      %15 = vector.shape_cast %14 : vector<16xf32> to vector<16x1xf32>
      %cst_15 = arith.constant 3.200000e+01 : f32
      %16 = vector.broadcast %cst_15 : f32 to vector<16x1xf32>
      %17 = arith.divf %15, %16 : vector<16x1xf32>
      %18 = vector.broadcast %17 : vector<16x1xf32> to vector<16x32xf32>
      %19 = arith.subf %11, %18 : vector<16x32xf32>
      %20 = arith.mulf %19, %19 : vector<16x32xf32>
      %cst_16 = arith.constant dense<0.000000e+00> : vector<16xf32>
      %21 = vector.multi_reduction <add>, %20, %cst_16 [1] : vector<16x32xf32> to vector<16xf32>
      %22 = vector.shape_cast %21 : vector<16xf32> to vector<16x1xf32>
      %cst_17 = arith.constant 3.200000e+01 : f32
      %23 = vector.broadcast %cst_17 : f32 to vector<16x1xf32>
      %24 = arith.divf %22, %23 : vector<16x1xf32>
      %25 = vector.broadcast %17 : vector<16x1xf32> to vector<16x32xf32>
      %26 = arith.subf %11, %25 : vector<16x32xf32>
      %cst_18 = arith.constant 9.99999974E-6 : f32
      %27 = vector.broadcast %cst_18 : f32 to vector<16x1xf32>
      %28 = arith.addf %24, %27 : vector<16x1xf32>
      %29 = math.rsqrt %28 : vector<16x1xf32>
      %30 = vector.broadcast %29 : vector<16x1xf32> to vector<16x32xf32>
      %31 = arith.mulf %26, %30 : vector<16x32xf32>
      %32 = vector.broadcast %12 : vector<1x32xf32> to vector<16x32xf32>
      %33 = arith.mulf %31, %32 : vector<16x32xf32>
      %34 = vector.broadcast %13 : vector<1x32xf32> to vector<16x32xf32>
      %35 = arith.addf %33, %34 : vector<16x32xf32>
      %36 = arith.truncf %35 : vector<16x32xf32> to vector<16x32xbf16>
      %c0_19 = arith.constant 0 : index
      %c0_20 = arith.constant 0 : index
      %37 = vector.load %arg7[%c0_19, %c0_20] : memref<16x32xbf16, #tpu.memory_space<vmem>>, vector<16x32xbf16>
      tpu.vector_store %arg7[%c0_19, %c0_20], %36 {strides = array<i32>} : memref<16x32xbf16, #tpu.memory_space<vmem>>, vector<16x32xbf16>,
    } else {
    }
    %c0 = arith.constant 0 : index
    %c0_1 = arith.constant 0 : index
    %3 = vector.load %arg7[%c0, %c0_1] : memref<16x32xbf16, #tpu.memory_space<vmem>>, vector<16x32xbf16>
    %c0_2 = arith.constant 0 : index
    %c0_3 = arith.constant 0 : index
    %c0_4 = arith.constant 0 : index
    %4 = vector.load %arg5[%c0_2, %c0_3, %c0_4] : memref<1x32x8xbf16, #tpu.memory_space<vmem>>, vector<1x32x8xbf16>
    %5 = vector.shape_cast %4 : vector<1x32x8xbf16> to vector<32x8xbf16>
    %cst = arith.constant dense<0.000000e+00> : vector<16x8xf32>
    %6 = tpu.matmul %3, %5, %cst {dimension_numbers = #tpu.dot_dimension_numbers<[1], [0], [0], [1], [0, 0, 1, 1], [], []>} : vector<16x32xbf16>, vector<32x8xbf16>, vector<16x8xf32> -> vector<16x8xf32>
    %7 = arith.truncf %6 : vector<16x8xf32> to vector<16x8xbf16>
    %c0_5 = arith.constant 0 : index
    %c0_6 = arith.constant 0 : index
    %c0_7 = arith.constant 0 : index
    %8 = vector.load %arg6[%c0_5, %c0_6, %c0_7] : memref<1x16x8xbf16, #tpu.memory_space<vmem>>, vector<1x16x8xbf16>
    %9 = vector.shape_cast %8 : vector<1x16x8xbf16> to vector<16x8xbf16>
    %10 = vector.shape_cast %7 : vector<16x8xbf16> to vector<1x16x8xbf16>
    tpu.vector_store %arg6[%c0_5, %c0_6, %c0_7], %10 {strides = array<i32>} : memref<1x16x8xbf16, #tpu.memory_space<vmem>>, vector<1x16x8xbf16>,
    return
  }
  func.func @transform_0(%arg0: i32, %arg1: i32) -> (i32, i32) {
    %c0_i32 = arith.constant 0 : i32
    %c0_i32_0 = arith.constant 0 : i32
    return %arg0, %c0_i32 : i32, i32
  }
  func.func @transform_1(%arg0: i32, %arg1: i32) -> (i32, i32) {
    %c0_i32 = arith.constant 0 : i32
    %c0_i32_0 = arith.constant 0 : i32
    %c0_i32_1 = arith.constant 0 : i32
    return %c0_i32, %c0_i32_0 : i32, i32
  }
  func.func @transform_2(%arg0: i32, %arg1: i32) -> (i32, i32) {
    %c0_i32 = arith.constant 0 : i32
    %c0_i32_0 = arith.constant 0 : i32
    %c0_i32_1 = arith.constant 0 : i32
    return %c0_i32, %c0_i32_0 : i32, i32
  }
  func.func @transform_3(%arg0: i32, %arg1: i32) -> (i32, i32, i32) {
    %c0_i32 = arith.constant 0 : i32
    %c0_i32_0 = arith.constant 0 : i32
    %c0_i32_1 = arith.constant 0 : i32
    return %arg1, %c0_i32, %c0_i32_0 : i32, i32, i32
  }
  func.func @transform_4(%arg0: i32, %arg1: i32) -> (i32, i32, i32) {
    %c0_i32 = arith.constant 0 : i32
    %c0_i32_0 = arith.constant 0 : i32
    return %arg1, %arg0, %c0_i32 : i32, i32, i32
  }
}

module attributes {stable_mosaic.version = 11 : i64} {
  func.func @flash_attn_kernel(%arg0: i32, %arg1: i32, %arg2: i32, %arg3: i32, %arg4: memref<1x1x1x8x8xbf16, #tpu.memory_space<vmem>>, %arg5: memref<1x1x1x8x8xbf16, #tpu.memory_space<vmem>>, %arg6: memref<1x1x1x8x8xbf16, #tpu.memory_space<vmem>>, %arg7: memref<1x1x8x8xbf16, #tpu.memory_space<vmem>>, %arg8: memref<8x1xf32, #tpu.memory_space<vmem>>, %arg9: memref<8x1xf32, #tpu.memory_space<vmem>>, %arg10: memref<8x8xf32, #tpu.memory_space<vmem>>) attributes {dimension_semantics = [#tpu.dimension_semantics<parallel>, #tpu.dimension_semantics<parallel>, #tpu.dimension_semantics<parallel>, #tpu.dimension_semantics<arbitrary>], iteration_bounds = array<i64: 4, 2, 1, 1>, scalar_prefetch = 0 : i64, scratch_operands = 3 : i64, tpu.core_type = #tpu.core_type<tc>, window_params = [{transform_indices = @transform_0, window_bounds = array<i64: 1, 1, 1, 8, 8>}, {transform_indices = @transform_1, window_bounds = array<i64: 1, 1, 1, 8, 8>}, {transform_indices = @transform_2, window_bounds = array<i64: 1, 1, 1, 8, 8>}, {transform_indices = @transform_3, window_bounds = array<i64: 1, 1, 8, 8>}]} {
    %c0_i32 = arith.constant 0 : i32
    %0 = arith.cmpi eq, %arg3, %c0_i32 : i32
    %1 = arith.extui %0 : i1 to i32
    %c0_i32_0 = arith.constant 0 : i32
    %2 = arith.cmpi ne, %1, %c0_i32_0 : i32
    scf.if %2 {
      %cst = arith.constant 0xFF800000 : f32
      %13 = vector.broadcast %cst : f32 to vector<8x1xf32>
      %c0 = arith.constant 0 : index
      %c0_6 = arith.constant 0 : index
      %14 = vector.load %arg8[%c0, %c0_6] : memref<8x1xf32, #tpu.memory_space<vmem>>, vector<8x1xf32>
      tpu.vector_store %arg8[%c0, %c0_6], %13 {strides = array<i32>} : memref<8x1xf32, #tpu.memory_space<vmem>>, vector<8x1xf32>,
      %cst_7 = arith.constant 0.000000e+00 : f32
      %15 = vector.broadcast %cst_7 : f32 to vector<8x1xf32>
      %c0_8 = arith.constant 0 : index
      %c0_9 = arith.constant 0 : index
      %16 = vector.load %arg9[%c0_8, %c0_9] : memref<8x1xf32, #tpu.memory_space<vmem>>, vector<8x1xf32>
      tpu.vector_store %arg9[%c0_8, %c0_9], %15 {strides = array<i32>} : memref<8x1xf32, #tpu.memory_space<vmem>>, vector<8x1xf32>,
      %cst_10 = arith.constant 0.000000e+00 : f32
      %17 = vector.broadcast %cst_10 : f32 to vector<8x8xf32>
      %c0_11 = arith.constant 0 : index
      %c0_12 = arith.constant 0 : index
      %18 = vector.load %arg10[%c0_11, %c0_12] : memref<8x8xf32, #tpu.memory_space<vmem>>, vector<8x8xf32>
      tpu.vector_store %arg10[%c0_11, %c0_12], %17 {strides = array<i32>} : memref<8x8xf32, #tpu.memory_space<vmem>>, vector<8x8xf32>,
    } else {
    }
    %c8_i32 = arith.constant 8 : i32
    %3 = arith.muli %arg2, %c8_i32 : i32
    %c8_i32_1 = arith.constant 8 : i32
    %4 = arith.addi %3, %c8_i32_1 : i32
    %c1_i32 = arith.constant 1 : i32
    %5 = arith.subi %4, %c1_i32 : i32
    %c8_i32_2 = arith.constant 8 : i32
    %6 = arith.muli %arg3, %c8_i32_2 : i32
    %7 = arith.cmpi sle, %6, %5 : i32
    %8 = arith.extui %7 : i1 to i32
    %c0_i32_3 = arith.constant 0 : i32
    %9 = arith.cmpi ne, %8, %c0_i32_3 : i32
    scf.if %9 {
      %c0 = arith.constant 0 : index
      %c0_6 = arith.constant 0 : index
      %c0_7 = arith.constant 0 : index
      %c0_8 = arith.constant 0 : index
      %c0_9 = arith.constant 0 : index
      %13 = vector.load %arg4[%c0, %c0_6, %c0_7, %c0_8, %c0_9] : memref<1x1x1x8x8xbf16, #tpu.memory_space<vmem>>, vector<1x1x1x8x8xbf16>
      %14 = vector.shape_cast %13 : vector<1x1x1x8x8xbf16> to vector<8x8xbf16>
      %c0_10 = arith.constant 0 : index
      %c0_11 = arith.constant 0 : index
      %c0_12 = arith.constant 0 : index
      %c0_13 = arith.constant 0 : index
      %c0_14 = arith.constant 0 : index
      %15 = vector.load %arg5[%c0_10, %c0_11, %c0_12, %c0_13, %c0_14] : memref<1x1x1x8x8xbf16, #tpu.memory_space<vmem>>, vector<1x1x1x8x8xbf16>
      %16 = vector.shape_cast %15 : vector<1x1x1x8x8xbf16> to vector<8x8xbf16>
      %cst = arith.constant dense<0.000000e+00> : vector<8x8xf32>
      %17 = tpu.matmul %14, %16, %cst {dimension_numbers = #tpu.dot_dimension_numbers<[1], [1], [0], [0], [0, 0, 1, 0], [], []>} : vector<8x8xbf16>, vector<8x8xbf16>, vector<8x8xf32> -> vector<8x8xf32>
      %c8_i32_15 = arith.constant 8 : i32
      %18 = arith.muli %arg2, %c8_i32_15 : i32
      %19 = tpu.iota {dimensions = array<i32: 0>} : vector<8x8xi32>
      %20 = vector.broadcast %18 : i32 to vector<8x8xi32>
      %21 = arith.addi %20, %19 : vector<8x8xi32>
      %22 = tpu.iota {dimensions = array<i32: 1>} : vector<8x8xi32>
      %23 = vector.broadcast %6 : i32 to vector<8x8xi32>
      %24 = arith.addi %23, %22 : vector<8x8xi32>
      %25 = arith.cmpi sle, %24, %21 : vector<8x8xi32>
      %cst_16 = arith.constant -1.000000e+30 : f32
      %26 = vector.broadcast %cst_16 : f32 to vector<8x8xf32>
      %27 = arith.select %25, %17, %26 : vector<8x8xi1>, vector<8x8xf32>
      %c0_17 = arith.constant 0 : index
      %c0_18 = arith.constant 0 : index
      %28 = vector.load %arg8[%c0_17, %c0_18] : memref<8x1xf32, #tpu.memory_space<vmem>>, vector<8x1xf32>
      %cst_19 = arith.constant dense<0xFF800000> : vector<8xf32>
      %29 = vector.multi_reduction <maximumf>, %27, %cst_19 [1] : vector<8x8xf32> to vector<8xf32>
      %30 = vector.shape_cast %29 : vector<8xf32> to vector<8x1xf32>
      %31 = arith.maximumf %28, %30 : vector<8x1xf32>
      %32 = arith.subf %28, %31 : vector<8x1xf32>
      %33 = math.exp %32 : vector<8x1xf32>
      %34 = vector.broadcast %31 : vector<8x1xf32> to vector<8x8xf32>
      %35 = arith.subf %27, %34 : vector<8x8xf32>
      %36 = math.exp %35 : vector<8x8xf32>
      %c0_20 = arith.constant 0 : index
      %c0_21 = arith.constant 0 : index
      %37 = vector.load %arg9[%c0_20, %c0_21] : memref<8x1xf32, #tpu.memory_space<vmem>>, vector<8x1xf32>
      %38 = arith.mulf %33, %37 : vector<8x1xf32>
      %cst_22 = arith.constant dense<0.000000e+00> : vector<8xf32>
      %39 = vector.multi_reduction <add>, %36, %cst_22 [1] : vector<8x8xf32> to vector<8xf32>
      %40 = vector.shape_cast %39 : vector<8xf32> to vector<8x1xf32>
      %41 = arith.addf %38, %40 : vector<8x1xf32>
      %c0_23 = arith.constant 0 : index
      %c0_24 = arith.constant 0 : index
      %42 = vector.load %arg9[%c0_23, %c0_24] : memref<8x1xf32, #tpu.memory_space<vmem>>, vector<8x1xf32>
      tpu.vector_store %arg9[%c0_23, %c0_24], %41 {strides = array<i32>} : memref<8x1xf32, #tpu.memory_space<vmem>>, vector<8x1xf32>,
      %c0_25 = arith.constant 0 : index
      %c0_26 = arith.constant 0 : index
      %43 = vector.load %arg10[%c0_25, %c0_26] : memref<8x8xf32, #tpu.memory_space<vmem>>, vector<8x8xf32>
      %44 = vector.broadcast %33 : vector<8x1xf32> to vector<8x8xf32>
      %45 = arith.mulf %44, %43 : vector<8x8xf32>
      %46 = arith.truncf %36 : vector<8x8xf32> to vector<8x8xbf16>
      %c0_27 = arith.constant 0 : index
      %c0_28 = arith.constant 0 : index
      %c0_29 = arith.constant 0 : index
      %c0_30 = arith.constant 0 : index
      %c0_31 = arith.constant 0 : index
      %47 = vector.load %arg6[%c0_27, %c0_28, %c0_29, %c0_30, %c0_31] : memref<1x1x1x8x8xbf16, #tpu.memory_space<vmem>>, vector<1x1x1x8x8xbf16>
      %48 = vector.shape_cast %47 : vector<1x1x1x8x8xbf16> to vector<8x8xbf16>
      %cst_32 = arith.constant dense<0.000000e+00> : vector<8x8xf32>
      %49 = tpu.matmul %46, %48, %cst_32 {dimension_numbers = #tpu.dot_dimension_numbers<[1], [0], [0], [1], [0, 0, 1, 1], [], []>} : vector<8x8xbf16>, vector<8x8xbf16>, vector<8x8xf32> -> vector<8x8xf32>
      %50 = arith.addf %45, %49 : vector<8x8xf32>
      %c0_33 = arith.constant 0 : index
      %c0_34 = arith.constant 0 : index
      %51 = vector.load %arg10[%c0_33, %c0_34] : memref<8x8xf32, #tpu.memory_space<vmem>>, vector<8x8xf32>
      tpu.vector_store %arg10[%c0_33, %c0_34], %50 {strides = array<i32>} : memref<8x8xf32, #tpu.memory_space<vmem>>, vector<8x8xf32>,
      %c0_35 = arith.constant 0 : index
      %c0_36 = arith.constant 0 : index
      %52 = vector.load %arg8[%c0_35, %c0_36] : memref<8x1xf32, #tpu.memory_space<vmem>>, vector<8x1xf32>
      tpu.vector_store %arg8[%c0_35, %c0_36], %31 {strides = array<i32>} : memref<8x1xf32, #tpu.memory_space<vmem>>, vector<8x1xf32>,
    } else {
    }
    %c0_i32_4 = arith.constant 0 : i32
    %10 = arith.cmpi eq, %arg3, %c0_i32_4 : i32
    %11 = arith.extui %10 : i1 to i32
    %c0_i32_5 = arith.constant 0 : i32
    %12 = arith.cmpi ne, %11, %c0_i32_5 : i32
    scf.if %12 {
      %c0 = arith.constant 0 : index
      %c0_6 = arith.constant 0 : index
      %13 = vector.load %arg10[%c0, %c0_6] : memref<8x8xf32, #tpu.memory_space<vmem>>, vector<8x8xf32>
      %c0_7 = arith.constant 0 : index
      %c0_8 = arith.constant 0 : index
      %14 = vector.load %arg9[%c0_7, %c0_8] : memref<8x1xf32, #tpu.memory_space<vmem>>, vector<8x1xf32>
      %15 = tpu.reciprocal %14 {approx = true} : vector<8x1xf32> -> vector<8x1xf32>
      %16 = vector.broadcast %15 : vector<8x1xf32> to vector<8x8xf32>
      %17 = arith.mulf %13, %16 : vector<8x8xf32>
      %18 = arith.truncf %17 : vector<8x8xf32> to vector<8x8xbf16>
      %c0_9 = arith.constant 0 : index
      %c0_10 = arith.constant 0 : index
      %c0_11 = arith.constant 0 : index
      %c0_12 = arith.constant 0 : index
      %19 = vector.load %arg7[%c0_9, %c0_10, %c0_11, %c0_12] : memref<1x1x8x8xbf16, #tpu.memory_space<vmem>>, vector<1x1x8x8xbf16>
      %20 = vector.shape_cast %19 : vector<1x1x8x8xbf16> to vector<8x8xbf16>
      %21 = vector.shape_cast %18 : vector<8x8xbf16> to vector<1x1x8x8xbf16>
      tpu.vector_store %arg7[%c0_9, %c0_10, %c0_11, %c0_12], %21 {strides = array<i32>} : memref<1x1x8x8xbf16, #tpu.memory_space<vmem>>, vector<1x1x8x8xbf16>,
    } else {
    }
    return
  }
  func.func @transform_0(%arg0: i32, %arg1: i32, %arg2: i32, %arg3: i32) -> (i32, i32, i32, i32, i32) {
    %c0_i32 = arith.constant 0 : i32
    %c0_i32_0 = arith.constant 0 : i32
    %c0_i32_1 = arith.constant 0 : i32
    return %c0_i32, %arg0, %arg1, %arg2, %c0_i32_0 : i32, i32, i32, i32, i32
  }
  func.func @transform_1(%arg0: i32, %arg1: i32, %arg2: i32, %arg3: i32) -> (i32, i32, i32, i32, i32) {
    %c1_i32 = arith.constant 1 : i32
    %c0_i32 = arith.constant 0 : i32
    %c0_i32_0 = arith.constant 0 : i32
    return %c1_i32, %arg0, %arg1, %arg3, %c0_i32 : i32, i32, i32, i32, i32
  }
  func.func @transform_2(%arg0: i32, %arg1: i32, %arg2: i32, %arg3: i32) -> (i32, i32, i32, i32, i32) {
    %c2_i32 = arith.constant 2 : i32
    %c0_i32 = arith.constant 0 : i32
    %c0_i32_0 = arith.constant 0 : i32
    return %c2_i32, %arg0, %arg1, %arg3, %c0_i32 : i32, i32, i32, i32, i32
  }
  func.func @transform_3(%arg0: i32, %arg1: i32, %arg2: i32, %arg3: i32) -> (i32, i32, i32, i32) {
    %c0_i32 = arith.constant 0 : i32
    %c0_i32_0 = arith.constant 0 : i32
    return %arg0, %arg1, %arg2, %c0_i32 : i32, i32, i32, i32
  }
}

module attributes {stable_mosaic.version = 11 : i64} {
  func.func @post_attn_mlp_kernel(%arg0: i32, %arg1: i32, %arg2: memref<16x32xf32, #tpu.memory_space<vmem>>, %arg3: memref<4x16x8xbf16, #tpu.memory_space<vmem>>, %arg4: memref<4x8x32xbf16, #tpu.memory_space<vmem>>, %arg5: memref<1x32xf32, #tpu.memory_space<vmem>>, %arg6: memref<1x32xf32, #tpu.memory_space<vmem>>, %arg7: memref<32x128xbf16, #tpu.memory_space<vmem>>, %arg8: memref<128x32xbf16, #tpu.memory_space<vmem>>, %arg9: memref<16x32xf32, #tpu.memory_space<vmem>>, %arg10: memref<16x32xf32, #tpu.memory_space<vmem>>, %arg11: memref<16x32xbf16, #tpu.memory_space<vmem>>, %arg12: memref<16x32xf32, #tpu.memory_space<vmem>>) attributes {dimension_semantics = [#tpu.dimension_semantics<parallel>, #tpu.dimension_semantics<arbitrary>], iteration_bounds = array<i64: 1, 1>, scalar_prefetch = 0 : i64, scratch_operands = 3 : i64, tpu.core_type = #tpu.core_type<tc>, window_params = [{transform_indices = @transform_0, window_bounds = array<i64: 16, 32>}, {transform_indices = @transform_1, window_bounds = array<i64: 4, 16, 8>}, {pipeline_mode = #tpu.pipeline_mode<synchronous>, transform_indices = @transform_2, window_bounds = array<i64: 4, 8, 32>}, {pipeline_mode = #tpu.pipeline_mode<synchronous>, transform_indices = @transform_3, window_bounds = array<i64: 1, 32>}, {pipeline_mode = #tpu.pipeline_mode<synchronous>, transform_indices = @transform_4, window_bounds = array<i64: 1, 32>}, {transform_indices = @transform_5, window_bounds = array<i64: 32, 128>}, {transform_indices = @transform_6, window_bounds = array<i64: 128, 32>}, {transform_indices = @transform_7, window_bounds = array<i64: 16, 32>}]} {
    %c0_i32 = arith.constant 0 : i32
    %0 = arith.cmpi eq, %arg1, %c0_i32 : i32
    %1 = arith.extui %0 : i1 to i32
    %c0_i32_0 = arith.constant 0 : i32
    %2 = arith.cmpi ne, %1, %c0_i32_0 : i32
    scf.if %2 {
      %c0_17 = arith.constant 0 : index
      %c0_18 = arith.constant 0 : index
      %28 = vector.load %arg2[%c0_17, %c0_18] : memref<16x32xf32, #tpu.memory_space<vmem>>, vector<16x32xf32>
      %c0_19 = arith.constant 0 : index
      %c0_20 = arith.constant 0 : index
      %c0_21 = arith.constant 0 : index
      %29 = vector.load %arg3[%c0_19, %c0_20, %c0_21] : memref<4x16x8xbf16, #tpu.memory_space<vmem>>, vector<1x16x8xbf16>
      %30 = vector.shape_cast %29 : vector<1x16x8xbf16> to vector<16x8xbf16>
      %c0_22 = arith.constant 0 : index
      %c0_23 = arith.constant 0 : index
      %c0_24 = arith.constant 0 : index
      %31 = vector.load %arg4[%c0_22, %c0_23, %c0_24] : memref<4x8x32xbf16, #tpu.memory_space<vmem>>, vector<1x8x32xbf16>
      %32 = vector.shape_cast %31 : vector<1x8x32xbf16> to vector<8x32xbf16>
      %cst_25 = arith.constant dense<0.000000e+00> : vector<16x32xf32>
      %33 = tpu.matmul %30, %32, %cst_25 {dimension_numbers = #tpu.dot_dimension_numbers<[1], [0], [0], [1], [0, 0, 1, 1], [], []>} : vector<16x8xbf16>, vector<8x32xbf16>, vector<16x32xf32> -> vector<16x32xf32>
      %34 = arith.addf %28, %33 : vector<16x32xf32>
      %c1 = arith.constant 1 : index
      %c0_26 = arith.constant 0 : index
      %c0_27 = arith.constant 0 : index
      %35 = vector.load %arg3[%c1, %c0_26, %c0_27] : memref<4x16x8xbf16, #tpu.memory_space<vmem>>, vector<1x16x8xbf16>
      %36 = vector.shape_cast %35 : vector<1x16x8xbf16> to vector<16x8xbf16>
      %c1_28 = arith.constant 1 : index
      %c0_29 = arith.constant 0 : index
      %c0_30 = arith.constant 0 : index
      %37 = vector.load %arg4[%c1_28, %c0_29, %c0_30] : memref<4x8x32xbf16, #tpu.memory_space<vmem>>, vector<1x8x32xbf16>
      %38 = vector.shape_cast %37 : vector<1x8x32xbf16> to vector<8x32xbf16>
      %cst_31 = arith.constant dense<0.000000e+00> : vector<16x32xf32>
      %39 = tpu.matmul %36, %38, %cst_31 {dimension_numbers = #tpu.dot_dimension_numbers<[1], [0], [0], [1], [0, 0, 1, 1], [], []>} : vector<16x8xbf16>, vector<8x32xbf16>, vector<16x32xf32> -> vector<16x32xf32>
      %40 = arith.addf %34, %39 : vector<16x32xf32>
      %c2 = arith.constant 2 : index
      %c0_32 = arith.constant 0 : index
      %c0_33 = arith.constant 0 : index
      %41 = vector.load %arg3[%c2, %c0_32, %c0_33] : memref<4x16x8xbf16, #tpu.memory_space<vmem>>, vector<1x16x8xbf16>
      %42 = vector.shape_cast %41 : vector<1x16x8xbf16> to vector<16x8xbf16>
      %c2_34 = arith.constant 2 : index
      %c0_35 = arith.constant 0 : index
      %c0_36 = arith.constant 0 : index
      %43 = vector.load %arg4[%c2_34, %c0_35, %c0_36] : memref<4x8x32xbf16, #tpu.memory_space<vmem>>, vector<1x8x32xbf16>
      %44 = vector.shape_cast %43 : vector<1x8x32xbf16> to vector<8x32xbf16>
      %cst_37 = arith.constant dense<0.000000e+00> : vector<16x32xf32>
      %45 = tpu.matmul %42, %44, %cst_37 {dimension_numbers = #tpu.dot_dimension_numbers<[1], [0], [0], [1], [0, 0, 1, 1], [], []>} : vector<16x8xbf16>, vector<8x32xbf16>, vector<16x32xf32> -> vector<16x32xf32>
      %46 = arith.addf %40, %45 : vector<16x32xf32>
      %c3 = arith.constant 3 : index
      %c0_38 = arith.constant 0 : index
      %c0_39 = arith.constant 0 : index
      %47 = vector.load %arg3[%c3, %c0_38, %c0_39] : memref<4x16x8xbf16, #tpu.memory_space<vmem>>, vector<1x16x8xbf16>
      %48 = vector.shape_cast %47 : vector<1x16x8xbf16> to vector<16x8xbf16>
      %c3_40 = arith.constant 3 : index
      %c0_41 = arith.constant 0 : index
      %c0_42 = arith.constant 0 : index
      %49 = vector.load %arg4[%c3_40, %c0_41, %c0_42] : memref<4x8x32xbf16, #tpu.memory_space<vmem>>, vector<1x8x32xbf16>
      %50 = vector.shape_cast %49 : vector<1x8x32xbf16> to vector<8x32xbf16>
      %cst_43 = arith.constant dense<0.000000e+00> : vector<16x32xf32>
      %51 = tpu.matmul %48, %50, %cst_43 {dimension_numbers = #tpu.dot_dimension_numbers<[1], [0], [0], [1], [0, 0, 1, 1], [], []>} : vector<16x8xbf16>, vector<8x32xbf16>, vector<16x32xf32> -> vector<16x32xf32>
      %52 = arith.addf %46, %51 : vector<16x32xf32>
      %c0_44 = arith.constant 0 : index
      %c0_45 = arith.constant 0 : index
      %53 = vector.load %arg10[%c0_44, %c0_45] : memref<16x32xf32, #tpu.memory_space<vmem>>, vector<16x32xf32>
      tpu.vector_store %arg10[%c0_44, %c0_45], %52 {strides = array<i32>} : memref<16x32xf32, #tpu.memory_space<vmem>>, vector<16x32xf32>,
      %c0_46 = arith.constant 0 : index
      %c0_47 = arith.constant 0 : index
      %54 = vector.load %arg5[%c0_46, %c0_47] : memref<1x32xf32, #tpu.memory_space<vmem>>, vector<1x32xf32>
      %c0_48 = arith.constant 0 : index
      %c0_49 = arith.constant 0 : index
      %55 = vector.load %arg6[%c0_48, %c0_49] : memref<1x32xf32, #tpu.memory_space<vmem>>, vector<1x32xf32>
      %cst_50 = arith.constant dense<0.000000e+00> : vector<16xf32>
      %56 = vector.multi_reduction <add>, %52, %cst_50 [1] : vector<16x32xf32> to vector<16xf32>
      %57 = vector.shape_cast %56 : vector<16xf32> to vector<16x1xf32>
      %cst_51 = arith.constant 3.200000e+01 : f32
      %58 = vector.broadcast %cst_51 : f32 to vector<16x1xf32>
      %59 = arith.divf %57, %58 : vector<16x1xf32>
      %60 = vector.broadcast %59 : vector<16x1xf32> to vector<16x32xf32>
      %61 = arith.subf %52, %60 : vector<16x32xf32>
      %62 = arith.mulf %61, %61 : vector<16x32xf32>
      %cst_52 = arith.constant dense<0.000000e+00> : vector<16xf32>
      %63 = vector.multi_reduction <add>, %62, %cst_52 [1] : vector<16x32xf32> to vector<16xf32>
      %64 = vector.shape_cast %63 : vector<16xf32> to vector<16x1xf32>
      %cst_53 = arith.constant 3.200000e+01 : f32
      %65 = vector.broadcast %cst_53 : f32 to vector<16x1xf32>
      %66 = arith.divf %64, %65 : vector<16x1xf32>
      %67 = vector.broadcast %59 : vector<16x1xf32> to vector<16x32xf32>
      %68 = arith.subf %52, %67 : vector<16x32xf32>
      %cst_54 = arith.constant 9.99999974E-6 : f32
      %69 = vector.broadcast %cst_54 : f32 to vector<16x1xf32>
      %70 = arith.addf %66, %69 : vector<16x1xf32>
      %71 = math.rsqrt %70 : vector<16x1xf32>
      %72 = vector.broadcast %71 : vector<16x1xf32> to vector<16x32xf32>
      %73 = arith.mulf %68, %72 : vector<16x32xf32>
      %74 = vector.broadcast %54 : vector<1x32xf32> to vector<16x32xf32>
      %75 = arith.mulf %73, %74 : vector<16x32xf32>
      %76 = vector.broadcast %55 : vector<1x32xf32> to vector<16x32xf32>
      %77 = arith.addf %75, %76 : vector<16x32xf32>
      %78 = arith.truncf %77 : vector<16x32xf32> to vector<16x32xbf16>
      %c0_55 = arith.constant 0 : index
      %c0_56 = arith.constant 0 : index
      %79 = vector.load %arg11[%c0_55, %c0_56] : memref<16x32xbf16, #tpu.memory_space<vmem>>, vector<16x32xbf16>
      tpu.vector_store %arg11[%c0_55, %c0_56], %78 {strides = array<i32>} : memref<16x32xbf16, #tpu.memory_space<vmem>>, vector<16x32xbf16>,
      %cst_57 = arith.constant 0.000000e+00 : f32
      %80 = vector.broadcast %cst_57 : f32 to vector<16x32xf32>
      %c0_58 = arith.constant 0 : index
      %c0_59 = arith.constant 0 : index
      %81 = vector.load %arg12[%c0_58, %c0_59] : memref<16x32xf32, #tpu.memory_space<vmem>>, vector<16x32xf32>
      tpu.vector_store %arg12[%c0_58, %c0_59], %80 {strides = array<i32>} : memref<16x32xf32, #tpu.memory_space<vmem>>, vector<16x32xf32>,
    } else {
    }
    %c0 = arith.constant 0 : index
    %c0_1 = arith.constant 0 : index
    %3 = vector.load %arg11[%c0, %c0_1] : memref<16x32xbf16, #tpu.memory_space<vmem>>, vector<16x32xbf16>
    %c0_2 = arith.constant 0 : index
    %c0_3 = arith.constant 0 : index
    %4 = vector.load %arg7[%c0_2, %c0_3] : memref<32x128xbf16, #tpu.memory_space<vmem>>, vector<32x128xbf16>
    %cst = arith.constant dense<0.000000e+00> : vector<16x128xf32>
    %5 = tpu.matmul %3, %4, %cst {dimension_numbers = #tpu.dot_dimension_numbers<[1], [0], [0], [1], [0, 0, 1, 1], [], []>} : vector<16x32xbf16>, vector<32x128xbf16>, vector<16x128xf32> -> vector<16x128xf32>
    %6 = arith.mulf %5, %5 : vector<16x128xf32>
    %7 = arith.mulf %5, %6 : vector<16x128xf32>
    %cst_4 = arith.constant 4.471500e-02 : f32
    %8 = vector.broadcast %cst_4 : f32 to vector<16x128xf32>
    %9 = arith.mulf %8, %7 : vector<16x128xf32>
    %10 = arith.addf %5, %9 : vector<16x128xf32>
    %cst_5 = arith.constant 0.797884583 : f32
    %11 = vector.broadcast %cst_5 : f32 to vector<16x128xf32>
    %12 = arith.mulf %11, %10 : vector<16x128xf32>
    %13 = math.tanh %12 : vector<16x128xf32>
    %cst_6 = arith.constant 1.000000e+00 : f32
    %14 = vector.broadcast %cst_6 : f32 to vector<16x128xf32>
    %15 = arith.addf %14, %13 : vector<16x128xf32>
    %cst_7 = arith.constant 5.000000e-01 : f32
    %16 = vector.broadcast %cst_7 : f32 to vector<16x128xf32>
    %17 = arith.mulf %16, %15 : vector<16x128xf32>
    %18 = arith.mulf %5, %17 : vector<16x128xf32>
    %c0_8 = arith.constant 0 : index
    %c0_9 = arith.constant 0 : index
    %19 = vector.load %arg12[%c0_8, %c0_9] : memref<16x32xf32, #tpu.memory_space<vmem>>, vector<16x32xf32>
    %20 = arith.truncf %18 : vector<16x128xf32> to vector<16x128xbf16>
    %c0_10 = arith.constant 0 : index
    %c0_11 = arith.constant 0 : index
    %21 = vector.load %arg8[%c0_10, %c0_11] : memref<128x32xbf16, #tpu.memory_space<vmem>>, vector<128x32xbf16>
    %cst_12 = arith.constant dense<0.000000e+00> : vector<16x32xf32>
    %22 = tpu.matmul %20, %21, %cst_12 {dimension_numbers = #tpu.dot_dimension_numbers<[1], [0], [0], [1], [0, 0, 1, 1], [], []>} : vector<16x128xbf16>, vector<128x32xbf16>, vector<16x32xf32> -> vector<16x32xf32>
    %23 = arith.addf %19, %22 : vector<16x32xf32>
    %c0_13 = arith.constant 0 : index
    %c0_14 = arith.constant 0 : index
    %24 = vector.load %arg12[%c0_13, %c0_14] : memref<16x32xf32, #tpu.memory_space<vmem>>, vector<16x32xf32>
    tpu.vector_store %arg12[%c0_13, %c0_14], %23 {strides = array<i32>} : memref<16x32xf32, #tpu.memory_space<vmem>>, vector<16x32xf32>,
    %c0_i32_15 = arith.constant 0 : i32
    %25 = arith.cmpi eq, %arg1, %c0_i32_15 : i32
    %26 = arith.extui %25 : i1 to i32
    %c0_i32_16 = arith.constant 0 : i32
    %27 = arith.cmpi ne, %26, %c0_i32_16 : i32
    scf.if %27 {
      %c0_17 = arith.constant 0 : index
      %c0_18 = arith.constant 0 : index
      %28 = vector.load %arg10[%c0_17, %c0_18] : memref<16x32xf32, #tpu.memory_space<vmem>>, vector<16x32xf32>
      %c0_19 = arith.constant 0 : index
      %c0_20 = arith.constant 0 : index
      %29 = vector.load %arg12[%c0_19, %c0_20] : memref<16x32xf32, #tpu.memory_space<vmem>>, vector<16x32xf32>
      %30 = arith.addf %28, %29 : vector<16x32xf32>
      %c0_21 = arith.constant 0 : index
      %c0_22 = arith.constant 0 : index
      %31 = vector.load %arg9[%c0_21, %c0_22] : memref<16x32xf32, #tpu.memory_space<vmem>>, vector<16x32xf32>
      tpu.vector_store %arg9[%c0_21, %c0_22], %30 {strides = array<i32>} : memref<16x32xf32, #tpu.memory_space<vmem>>, vector<16x32xf32>,
    } else {
    }
    return
  }
  func.func @transform_0(%arg0: i32, %arg1: i32) -> (i32, i32) {
    %c0_i32 = arith.constant 0 : i32
    %c0_i32_0 = arith.constant 0 : i32
    return %arg0, %c0_i32 : i32, i32
  }
  func.func @transform_1(%arg0: i32, %arg1: i32) -> (i32, i32, i32) {
    %c0_i32 = arith.constant 0 : i32
    %c0_i32_0 = arith.constant 0 : i32
    %c0_i32_1 = arith.constant 0 : i32
    return %c0_i32, %arg0, %c0_i32_0 : i32, i32, i32
  }
  func.func @transform_2(%arg0: i32, %arg1: i32) -> (i32, i32, i32) {
    %c0_i32 = arith.constant 0 : i32
    %c0_i32_0 = arith.constant 0 : i32
    %c0_i32_1 = arith.constant 0 : i32
    %c0_i32_2 = arith.constant 0 : i32
    return %c0_i32, %c0_i32_0, %c0_i32_1 : i32, i32, i32
  }
  func.func @transform_3(%arg0: i32, %arg1: i32) -> (i32, i32) {
    %c0_i32 = arith.constant 0 : i32
    %c0_i32_0 = arith.constant 0 : i32
    %c0_i32_1 = arith.constant 0 : i32
    return %c0_i32, %c0_i32_0 : i32, i32
  }
  func.func @transform_4(%arg0: i32, %arg1: i32) -> (i32, i32) {
    %c0_i32 = arith.constant 0 : i32
    %c0_i32_0 = arith.constant 0 : i32
    %c0_i32_1 = arith.constant 0 : i32
    return %c0_i32, %c0_i32_0 : i32, i32
  }
  func.func @transform_5(%arg0: i32, %arg1: i32) -> (i32, i32) {
    %c0_i32 = arith.constant 0 : i32
    %c0_i32_0 = arith.constant 0 : i32
    return %c0_i32, %arg1 : i32, i32
  }
  func.func @transform_6(%arg0: i32, %arg1: i32) -> (i32, i32) {
    %c0_i32 = arith.constant 0 : i32
    %c0_i32_0 = arith.constant 0 : i32
    return %arg1, %c0_i32 : i32, i32
  }
  func.func @transform_7(%arg0: i32, %arg1: i32) -> (i32, i32) {
    %c0_i32 = arith.constant 0 : i32
    %c0_i32_0 = arith.constant 0 : i32
    return %arg0, %c0_i32 : i32, i32
  }
}

module attributes {stable_mosaic.version = 11 : i64} {
  func.func @ln_matmul_kernel(%arg0: i32, %arg1: i32, %arg2: memref<2x32xf32, #tpu.memory_space<vmem>>, %arg3: memref<1x32xf32, #tpu.memory_space<vmem>>, %arg4: memref<1x32xf32, #tpu.memory_space<vmem>>, %arg5: memref<32x64xbf16, #tpu.memory_space<vmem>>, %arg6: memref<2x64xf32, #tpu.memory_space<vmem>>, %arg7: memref<2x32xbf16, #tpu.memory_space<vmem>>) attributes {dimension_semantics = [#tpu.dimension_semantics<parallel>, #tpu.dimension_semantics<arbitrary>], iteration_bounds = array<i64: 1, 1>, scalar_prefetch = 0 : i64, scratch_operands = 1 : i64, tpu.core_type = #tpu.core_type<tc>, window_params = [{transform_indices = @transform_0, window_bounds = array<i64: 2, 32>}, {pipeline_mode = #tpu.pipeline_mode<synchronous>, transform_indices = @transform_1, window_bounds = array<i64: 1, 32>}, {pipeline_mode = #tpu.pipeline_mode<synchronous>, transform_indices = @transform_2, window_bounds = array<i64: 1, 32>}, {pipeline_mode = #tpu.pipeline_mode<synchronous>, transform_indices = @transform_3, window_bounds = array<i64: 32, 64>}, {transform_indices = @transform_4, window_bounds = array<i64: 2, 64>}]} {
    %c0_i32 = arith.constant 0 : i32
    %0 = arith.cmpi eq, %arg1, %c0_i32 : i32
    %1 = arith.extui %0 : i1 to i32
    %c0_i32_0 = arith.constant 0 : i32
    %2 = arith.cmpi ne, %1, %c0_i32_0 : i32
    scf.if %2 {
      %c0_6 = arith.constant 0 : index
      %c0_7 = arith.constant 0 : index
      %7 = vector.load %arg2[%c0_6, %c0_7] : memref<2x32xf32, #tpu.memory_space<vmem>>, vector<2x32xf32>
      %c0_8 = arith.constant 0 : index
      %c0_9 = arith.constant 0 : index
      %8 = vector.load %arg3[%c0_8, %c0_9] : memref<1x32xf32, #tpu.memory_space<vmem>>, vector<1x32xf32>
      %c0_10 = arith.constant 0 : index
      %c0_11 = arith.constant 0 : index
      %9 = vector.load %arg4[%c0_10, %c0_11] : memref<1x32xf32, #tpu.memory_space<vmem>>, vector<1x32xf32>
      %cst_12 = arith.constant dense<0.000000e+00> : vector<2xf32>
      %10 = vector.multi_reduction <add>, %7, %cst_12 [1] : vector<2x32xf32> to vector<2xf32>
      %11 = vector.shape_cast %10 : vector<2xf32> to vector<2x1xf32>
      %cst_13 = arith.constant 3.200000e+01 : f32
      %12 = vector.broadcast %cst_13 : f32 to vector<2x1xf32>
      %13 = arith.divf %11, %12 : vector<2x1xf32>
      %14 = vector.broadcast %13 : vector<2x1xf32> to vector<2x32xf32>
      %15 = arith.subf %7, %14 : vector<2x32xf32>
      %16 = arith.mulf %15, %15 : vector<2x32xf32>
      %cst_14 = arith.constant dense<0.000000e+00> : vector<2xf32>
      %17 = vector.multi_reduction <add>, %16, %cst_14 [1] : vector<2x32xf32> to vector<2xf32>
      %18 = vector.shape_cast %17 : vector<2xf32> to vector<2x1xf32>
      %cst_15 = arith.constant 3.200000e+01 : f32
      %19 = vector.broadcast %cst_15 : f32 to vector<2x1xf32>
      %20 = arith.divf %18, %19 : vector<2x1xf32>
      %21 = vector.broadcast %13 : vector<2x1xf32> to vector<2x32xf32>
      %22 = arith.subf %7, %21 : vector<2x32xf32>
      %cst_16 = arith.constant 9.99999974E-6 : f32
      %23 = vector.broadcast %cst_16 : f32 to vector<2x1xf32>
      %24 = arith.addf %20, %23 : vector<2x1xf32>
      %25 = math.rsqrt %24 : vector<2x1xf32>
      %26 = vector.broadcast %25 : vector<2x1xf32> to vector<2x32xf32>
      %27 = arith.mulf %22, %26 : vector<2x32xf32>
      %28 = vector.broadcast %8 : vector<1x32xf32> to vector<2x32xf32>
      %29 = arith.mulf %27, %28 : vector<2x32xf32>
      %30 = vector.broadcast %9 : vector<1x32xf32> to vector<2x32xf32>
      %31 = arith.addf %29, %30 : vector<2x32xf32>
      %32 = arith.truncf %31 : vector<2x32xf32> to vector<2x32xbf16>
      %c0_17 = arith.constant 0 : index
      %c0_18 = arith.constant 0 : index
      %33 = vector.load %arg7[%c0_17, %c0_18] : memref<2x32xbf16, #tpu.memory_space<vmem>>, vector<2x32xbf16>
      tpu.vector_store %arg7[%c0_17, %c0_18], %32 {strides = array<i32>} : memref<2x32xbf16, #tpu.memory_space<vmem>>, vector<2x32xbf16>,
    } else {
    }
    %c0 = arith.constant 0 : index
    %c0_1 = arith.constant 0 : index
    %3 = vector.load %arg7[%c0, %c0_1] : memref<2x32xbf16, #tpu.memory_space<vmem>>, vector<2x32xbf16>
    %c0_2 = arith.constant 0 : index
    %c0_3 = arith.constant 0 : index
    %4 = vector.load %arg5[%c0_2, %c0_3] : memref<32x64xbf16, #tpu.memory_space<vmem>>, vector<32x64xbf16>
    %cst = arith.constant dense<0.000000e+00> : vector<2x64xf32>
    %5 = tpu.matmul %3, %4, %cst {dimension_numbers = #tpu.dot_dimension_numbers<[1], [0], [0], [1], [0, 0, 1, 1], [], []>} : vector<2x32xbf16>, vector<32x64xbf16>, vector<2x64xf32> -> vector<2x64xf32>
    %c0_4 = arith.constant 0 : index
    %c0_5 = arith.constant 0 : index
    %6 = vector.load %arg6[%c0_4, %c0_5] : memref<2x64xf32, #tpu.memory_space<vmem>>, vector<2x64xf32>
    tpu.vector_store %arg6[%c0_4, %c0_5], %5 {strides = array<i32>} : memref<2x64xf32, #tpu.memory_space<vmem>>, vector<2x64xf32>,
    return
  }
  func.func @transform_0(%arg0: i32, %arg1: i32) -> (i32, i32) {
    %c0_i32 = arith.constant 0 : i32
    %c0_i32_0 = arith.constant 0 : i32
    return %arg0, %c0_i32 : i32, i32
  }
  func.func @transform_1(%arg0: i32, %arg1: i32) -> (i32, i32) {
    %c0_i32 = arith.constant 0 : i32
    %c0_i32_0 = arith.constant 0 : i32
    %c0_i32_1 = arith.constant 0 : i32
    return %c0_i32, %c0_i32_0 : i32, i32
  }
  func.func @transform_2(%arg0: i32, %arg1: i32) -> (i32, i32) {
    %c0_i32 = arith.constant 0 : i32
    %c0_i32_0 = arith.constant 0 : i32
    %c0_i32_1 = arith.constant 0 : i32
    return %c0_i32, %c0_i32_0 : i32, i32
  }
  func.func @transform_3(%arg0: i32, %arg1: i32) -> (i32, i32) {
    %c0_i32 = arith.constant 0 : i32
    %c0_i32_0 = arith.constant 0 : i32
    return %c0_i32, %arg1 : i32, i32
  }
  func.func @transform_4(%arg0: i32, %arg1: i32) -> (i32, i32) {
    %c0_i32 = arith.constant 0 : i32
    return %arg0, %arg1 : i32, i32
  }
}

</mosaic_0001>

<bundles_post_ra>
// kernel: gpt_forward.8
= control target key start
LH: loop header
LB: loop body
LE: loop exit
PB: predicated region body
PF: predicated region fallthrough
CT: control target
= control target key end

     0   :  { %s803_s12 = smov 0   ;;  %s805_s13 = smov 0   ;;  %s877_s0 = inlined_call_operand.vmem [shape: bf16[3,4,2,8,8], index: 0, kind: input, shape index: {}, may-alias: {0,1,2}]   ;;  %s878_s1 = inlined_call_operand.vmem [shape: bf16[3,4,2,8,8], index: 1, kind: input, shape index: {}, may-alias: {0,1,2}]   ;;  %s879_s2 = inlined_call_operand.vmem [shape: bf16[3,4,2,8,8], index: 2, kind: input, shape index: {}, may-alias: {0,1,2}]   ;;  %s880_s3 = inlined_call_operand.vmem [shape: bf16[4,2,8,8], index: 3, kind: output, shape index: {}]  }
   0x1   :  { %s807_s14 = smov 0   ;;  %s809_s15 = smov 0  }
   0x2   :  { %s811_s16 = smov 0  }
   0x3 LB: > { %s35_s17 = sadd.s32 1, %s769_s14  ;;  %s39_s18 = sadd.s32 1, %s773_s15  ;;  %s777_s16 = sphi %s811_s16, %s13_s16   ;;  %s773_s15 = sphi %s809_s15, %s884_s15   ;;  %s769_s14 = sphi %s807_s14, %s883_s14   ;;  %s765_s13 = sphi %s805_s13, %s882_s13   ;;  %s761_s12 = sphi %s803_s12, %s881_s12  }
   0x4   : > { %p37_p0 = scmp.ge.s32.totalorder %s35_s17, 2  ;;  %p656_p1 = scmp.ge.s32.totalorder %s777_s16, 1 }
   0x5   : > { %p219_p2 = scmp.lt.s32.totalorder %s777_s16, 9 }
   0x6   : > { %s886_s17 = smov (%p37_p0, %s35_s17), 0  ;;  %s888_s18 = smov (!%p37_p0, %s39_s18), %s773_s15 }
   0x7   : > { %p220_p3 = pnand %p656_p1, %p219_p2  ;;  %p41_p4 = scmp.ge.s32.totalorder %s888_s18, 4 }
   0x8   : > { %p279_p5 = scmp.lt.s32.totalorder (!%p220_p3), %s765_s13, 3  ;;  %p281_p6 = scmp.lt.s32.totalorder (!%p220_p3), %s761_s12, 1 }
   0x9   : > { %s890_s18 = smov (%p41_p4, %s888_s18), 0  ;;  %223 = sbr.rel (%p220_p3) target bundleno = 797 (0x31d), region = 32 }
   0xe   : > { %vm333_vm0 = vcmask 64512   ;;  %v779_v0 = vmov 0.0   ;;  %vm780_vm1 = vmmov 0   ;;  %s892_s13 = smov (!%p279_p5, %s765_s13), 3  ;;  %s894_s12 = smov (!%p281_p6, %s761_s12), 1  ;;  %vm330_vm2 = vcmask 7168  }
   0xf   : > { %675 = vmatprep.subr.bf16.mxu0 %v779_v0  ;;  %334 = vst.msk [vmem:[#allocation4] sm:$0xff] %vm333_vm0, %v779_v0  ;;  %677 = vmatprep.mubr.msk.bf16.mxu0 %vm780_vm1, %v779_v0  ;;  %s657_s19 = sshll.u32 %s892_s13, 1  ;;  %v781_v4 = vmov -inf   ;;  %v391_v5 = vlaneseq  ;;  %v782_v14 = vmov 0   ;;  %vm437_vm4 = vcmask 1043456  }
  0x10   : > { %681 = vmatprep.subr.bf16.mxu1 %v779_v0  ;;  %683 = vmatprep.mubr.msk.bf16.mxu1 %vm780_vm1, %v779_v0  ;;  %s287_s20 = sadd.s32 %s657_s19, %s894_s12  ;;  %331 = vst.msk [vmem:[#allocation2] sm:$0xff] %vm330_vm2, %v781_v4  ;;  %332 = vst.msk [vmem:[#allocation3] sm:$0xff] %vm330_vm2, %v779_v0  ;;  %vm497_vm5 = vcmask 60416  }
  0x11   : > { %s834_s21 = sshll.u32 %s287_s20, 2  ;;  %v392_v6 = vshrl.u32 %v391_v5, 7  ;;  %v396_v7 = vand.u32 127, %v391_v5  ;;  %731 = vset.pattern.permute.xlu0 %v782_v14  ;;  %732 = vset.pattern.permute.xlu1 %v782_v14 }
  0x12   : > { %s580_s24 = scalar_lea.vmem %s878_s1, %s834_s21  ;;  %s289_s27 = scalar_lea.vmem %s877_s0, %s834_s21 }
  0x13   : > { %v665_v1 = vld [vmem:[%s580_s24 + $0x20] sm:$0xf]  ;;  %vm399_vm3 = vcmp.le.s32.totalorder %v396_v7, %v392_v6  ;;  %s586_s30 = scalar_lea.vmem %s879_s2, %s834_s21  ;;  %s324_s6 = scalar_lea.vmem %s880_s3, %s834_s21 }
  0x14   : > { %v349_v2 = vsel %vm333_vm0, %v665_v1, 0  ;;  %v342_v3 = vld [vmem:[%s289_s27] sm:$0xf] }
  0x15   : > { %676 = vmatpush3.bf16.xpose.msra.mxu0 %v349_v2  ;;  %v667_v19 = vld [vmem:[%s586_s30 + $0x40] sm:$0xf] }
  0x16   : > { %v439_v20 = vsel %vm437_vm4, %v667_v19, 0  ;;  %v425_v35 = vld [vmem:[#allocation4] sm:$0xff] }
  0x17   : > { %v401_v15 = vld [vmem:[#allocation2] sm:$0xff]  ;;  %682 = vmatpush3.bf16.msra.mxu1 %v439_v20  ;;  %v417_v29 = vld [vmem:[#allocation3] sm:$0xff] }
  0x1c   : > { %678 = vmatmul.mubr.msk.bf16.vlgmr.msra.gmra.mxu0 %vm333_vm0, %v342_v3 }
  0xdc   : > { %v385_v8 = vpop.f32.mrf.mxu0 }
  0xdd   : > { %v400_v9 = vsel %vm399_vm3, %v385_v8, -1e+30 }
  0xde   : > { %v679_v10 = vpop.f32.mrf.mxu0  ;;  %v402_v11 = vsel %vm333_vm0, %v400_v9, -inf }
  0xdf   : > { %403 = vmax.xlane.f32.xlu0 %v402_v11 }
  0xe0   : > { %v388_v12 = vpop.f32.mrf.mxu0 }
  0xe2   : > { %v680_v13 = vpop.f32.mrf.mxu0 }
 0x168   : > { %v404_v16 = vpop.xlane.xlu0 %403 }
 0x169   : > { %v405_v17 = vmax.f32 %v401_v15, %v404_v16 }
 0x16b   : > { %v406_v18 = vsub.f32 %v401_v15, %v405_v17  ;;  %483 = vst.msk [vmem:[#allocation2] sm:$0xff] %vm330_vm2, %v405_v17  ;;  %411 = vperm.xlu0 %731, %v405_v17  }
 0x16d   : > { %v407_v25 = vmul.f32 1.442695, %v406_v18 }
 0x1e6   : > { %v412_v21 = vpop.permute.xlu0 %411 }
 0x1e7   : > { %v414_v22 = vsub.f32 %v400_v9, %v412_v21 }
 0x1e9   : > { %v415_v23 = vmul.f32 1.442695, %v414_v22 }
 0x1eb   : > { %733 = vpow2.f32 %v415_v23 }
 0x1ec   : > { %735 = vpow2.f32 %v407_v25 }
 0x1f8   : > { %v734_v24 = vpop.eup %733 }
 0x1f9   : > { %v419_v26 = vsel %vm333_vm0, %v734_v24, 0.0  ;;  %v432_v27 = vpack.c.bf16 %v734_v24, %v734_v24  ;;  %v736_v28 = vpop.eup %735 }
 0x1fa   : > { %420 = vadd.xlane.f32.xlu1 %v419_v26  ;;  %v418_v30 = vmul.f32 %v736_v28, %v417_v29 }
 0x1fb   : > { %684 = vmatmul.mubr.msk.bf16.vlgmr.msra.gmra.mxu1 %vm333_vm0, %v432_v27 }
 0x20b   : > { %428 = vperm.xlu1 %732, %v736_v28  }
 0x283   : > { %v421_v31 = vpop.xlane.xlu1 %420 }
 0x284   : > { %v422_v32 = vadd.f32 %v421_v31, %v418_v30 }
 0x286   : > { %424 = vst.msk [vmem:[#allocation3] sm:$0xff] %vm330_vm2, %v422_v32 }
 0x287   : > { %v429_v36 = vpop.permute.xlu1 %428 }
 0x288   : > { %v431_v37 = vmul.f32 %v429_v36, %v425_v35 }
 0x28d   : > { %v488_v33 = vld [vmem:[#allocation3] sm:$0xff] }
 0x28e   : > { %737 = vrcp.f32 %v488_v33 }
 0x29b   : > { %v738_v34 = vpop.eup %737 }
 0x29c   : > { %492 = vperm.xlu1 %732, %v738_v34  }
 0x2bb   : > { %v475_v38 = vpop.f32.mrf.mxu1 }
 0x2bc   : > { %v481_v39 = vadd.f32 %v475_v38, %v431_v37 }
 0x2bd   : > { %v685_v40 = vpop.f32.mrf.mxu1 }
 0x2be   : > { %482 = vst.msk [vmem:[#allocation4] sm:$0xff] %vm333_vm0, %v481_v39 }
 0x2bf   : > { %v478_v41 = vpop.f32.mrf.mxu1 }
 0x2c1   : > { %v686_v42 = vpop.f32.mrf.mxu1 }
 0x2c5   : > { %v487_v43 = vld [vmem:[#allocation4] sm:$0xff] }
 0x317   : > { %v493_v44 = vpop.permute.xlu1 %492 }
 0x318   : > { %v495_v45 = vmul.f32 %v493_v44, %v487_v43 }
 0x31a   : > { %v496_v46 = vpack.c.bf16 %v495_v45, %v495_v45 }
 0x31c   : > { %498 = vst.msk [vmem:[%s324_s6] sm:$0xf] %vm497_vm5, %v496_v46 }
 0x31d PF: > { %s13_s16 = sadd.s32 1, %s777_s16   ;;  %s881_s12 = smov %s769_s14 }
 0x31e   : > { %p10_p7 = scmp.ge.s32.totalorder %s13_s16, 10   ;;  %s882_s13 = smov %s773_s15 }
 0x31f   : > { %s883_s14 = smov %s886_s17  ;;  %s884_s15 = smov %s890_s18 }
 0x320   :  { %12 = sbr.rel (!%p10_p7) target bundleno = 3 (0x3), region = 80 }

// kernel: gpt_forward.7
= control target key start
LH: loop header
LB: loop body
LE: loop exit
PB: predicated region body
PF: predicated region fallthrough
CT: control target
= control target key end

     0   :  { %s606_s15 = smov 0   ;;  %s608_s16 = smov 0   ;;  %s663_s0 = inlined_call_operand.vmem [shape: f32[16,32], index: 0, kind: input, shape index: {}]   ;;  %s664_s1 = inlined_call_operand.vmem [shape: f32[1,32], index: 1, kind: input, shape index: {}]   ;;  %s665_s2 = inlined_call_operand.vmem [shape: f32[1,32], index: 2, kind: input, shape index: {}]   ;;  %s666_s3 = inlined_call_operand.vmem [shape: bf16[12,32,8], index: 3, kind: input, shape index: {}]   ;;  %s667_s4 = inlined_call_operand.vmem [shape: bf16[12,16,8], index: 4, kind: output, shape index: {}]  }
   0x1   :  { %s610_s17 = smov 0  }
   0x2 LB: > { %s23_s18 = sadd.s32 1, %s573_s16  ;;  %p487_p0 = scmp.ge.s32.totalorder %s577_s17, 1  ;;  %s577_s17 = sphi %s610_s17, %s14_s17   ;;  %s573_s16 = sphi %s608_s16, %s669_s16   ;;  %s569_s15 = sphi %s606_s15, %s668_s15  }
   0x3   : > { %p24_p1 = scmp.ge.s32.totalorder %s23_s18, 12  ;;  %p187_p2 = scmp.lt.s32.totalorder %s577_s17, 13 }
   0x5   : > { %s671_s18 = smov (%p24_p1, %s23_s18), 0  ;;  %p188_p3 = pnand %p487_p0, %p187_p2 }
   0x6   : > { %p228_p4 = scmp.lt.s32.totalorder (!%p188_p3), %s569_s15, 11  ;;  %p492_p5 = scmp.ne.s32.totalorder (!%p188_p3), %s569_s15, 0 }
   0x7   : > { %191 = sbr.rel (%p188_p3) target bundleno = 543 (0x21f), region = 36 }
   0xc   : > { %s229_s19 = scalar_select %p228_p4, %s569_s15, 11 }
   0xd   : > { %247 = sbr.rel (%p492_p5) target bundleno = 334 (0x14e), region = 40 }
   0xe   : > { %s505_s20 = sshll.u32 %s229_s19, 4  ;;  %s506_s21 = sshll.u32 %s229_s19, 3 }
   0xf   : > { %s627_s24 = scalar_lea.vmem %s666_s3, %s505_s20  ;;  %s632_s27 = scalar_lea.vmem %s667_s4, %s506_s21 }
  0x12   : > { %v248_v0 = vld [vmem:[%s663_s0] sm:$0xff]  ;;  %vm252_vm0 = vcmask 261120   ;;  %v249_v1 = vld [vmem:[%s663_s0 + $0x8] sm:$0xff]  ;;  %vm304_vm1 = vcmask 257024  }
  0x13   : > { %v253_v2 = vsel %vm252_vm0, %v248_v0, 0.0  ;;  %v256_v3 = vsel %vm252_vm0, %v249_v1, 0.0  ;;  %v493_v21 = vld [vmem:[%s664_s1] ss:$0 sm:$0xff] }
  0x14   : > { %254 = vadd.xlane.f32.xlu0 %v253_v2  ;;  %v494_v23 = vld [vmem:[%s665_s2] ss:$0 sm:$0xff] }
  0x18   : > { %257 = vadd.xlane.f32.xlu0 %v256_v3 }
  0x9d   : > { %v255_v4 = vpop.xlane.xlu0 %254 }
  0x9e   : > { %v260_v5 = vmul.f32 0.03125, %v255_v4 }
  0xa0   : > { %v262_v6 = vsub.f32 %v248_v0, %v260_v5 }
  0xa1   : > { %v258_v7 = vpop.xlane.xlu0 %257 }
  0xa2   : > { %v261_v8 = vmul.f32 0.03125, %v258_v7  ;;  %v264_v9 = vmul.f32 %v262_v6, %v262_v6 }
  0xa4   : > { %v263_v10 = vsub.f32 %v249_v1, %v261_v8  ;;  %v266_v11 = vsel %vm252_vm0, %v264_v9, 0.0 }
  0xa5   : > { %267 = vadd.xlane.f32.xlu1 %v266_v11 }
  0xa6   : > { %v265_v12 = vmul.f32 %v263_v10, %v263_v10 }
  0xa8   : > { %v269_v13 = vsel %vm252_vm0, %v265_v12, 0.0 }
  0xa9   : > { %270 = vadd.xlane.f32.xlu1 %v269_v13 }
 0x12e   : > { %v268_v14 = vpop.xlane.xlu1 %267 }
 0x12f   : > { %v272_v15 = vmul.f32 0.03125, %v268_v14 }
 0x131   : > { %v274_v16 = vadd.f32 1e-05, %v272_v15 }
 0x132   : > { %v271_v17 = vpop.xlane.xlu1 %270 }
 0x133   : > { %548 = vrsqrt.f32 %v274_v16  ;;  %v273_v18 = vmul.f32 0.03125, %v271_v17 }
 0x135   : > { %v275_v19 = vadd.f32 1e-05, %v273_v18 }
 0x137   : > { %550 = vrsqrt.f32 %v275_v19 }
 0x140   : > { %v549_v20 = vpop.eup %548 }
 0x141   : > { %v278_v22 = vmul.f32 %v549_v20, %v262_v6 }
 0x143   : > { %v286_v24 = vmul.f32 %v493_v21, %v278_v22 }
 0x144   : > { %v551_v25 = vpop.eup %550 }
 0x145   : > { %v294_v26 = vadd.f32 %v494_v23, %v286_v24  ;;  %v279_v27 = vmul.f32 %v551_v25, %v263_v10 }
 0x147   : > { %v507_v28 = vpack.c.bf16 %v294_v26, %v294_v26  ;;  %v287_v29 = vmul.f32 %v493_v21, %v279_v27 }
 0x149   : > { %305 = vst.msk [vmem:[#allocation2] sm:$0xf] %vm304_vm1, %v507_v28  ;;  %v295_v30 = vadd.f32 %v494_v23, %v287_v29 }
 0x14b   : > { %v508_v31 = vpack.c.bf16 %v295_v30, %v295_v30 }
 0x14d   : > { %306 = vst.msk [vmem:[#allocation2 + $0x4] sm:$0xf] %vm304_vm1, %v508_v31 }
 0x14e PF: > { %v552_v32 = vld [vmem:[%s627_s24 + $0x8] sm:$0xff]   ;;  %v579_v33 = vmov 0.0   ;;  %v553_v34 = vld [vmem:[%s627_s24] sm:$0xff]   ;;  %vm580_vm2 = vmmov 0   ;;  %vm330_vm3 = vcmask 261120   ;;  %vm383_vm4 = vcmask 60416  }
 0x14f   : > { %514 = vmatprep.subr.bf16.mxu0 %v579_v33  ;;  %518 = vmatprep.mubr.msk.bf16.mxu0 %vm580_vm2, %v579_v33 }
 0x150   : > { %515 = vmatpush3.bf16.msra.mxu0 %v552_v32 }
 0x151   : > { %516 = vmatprep.subr.bf16.mxu0 %v579_v33 }
 0x154   : > { %v554_v35 = vld [vmem:[#allocation2] sm:$0xff]   ;;  %517 = vmatpush3.bf16.msra.mxu0 %v553_v34 }
 0x157   : > { %519 = vmatmul.mubr.msk.bf16.vlgmr.msra.gmra.mxu0 %vm330_vm3, %v554_v35 }
 0x217   : > { %v368_v36 = vpop.f32.mrf.mxu0 }
 0x218   : > { %v509_v37 = vpack.c.bf16 %v368_v36, %v368_v36 }
 0x219   : > { %v520_v38 = vpop.f32.mrf.mxu0 }
 0x21a   : > { %384 = vst.msk [vmem:[%s632_s27] sm:$0xf] %vm383_vm4, %v509_v37 }
 0x21b   : > { %v371_v39 = vpop.f32.mrf.mxu0 }
 0x21c   : > { %v510_v40 = vpack.c.bf16 %v371_v39, %v371_v39 }
 0x21d   : > { %v521_v41 = vpop.f32.mrf.mxu0 }
 0x21e   : > { %385 = vst.msk [vmem:[%s632_s27 + $0x4] sm:$0xf] %vm383_vm4, %v510_v40 }
 0x21f PF: > { %s14_s17 = sadd.s32 1, %s577_s17   ;;  %s668_s15 = smov %s573_s16 }
 0x220   : > { %p11_p6 = scmp.ge.s32.totalorder %s14_s17, 14   ;;  %s669_s16 = smov %s671_s18 }
 0x222   :  { %13 = sbr.rel (!%p11_p6) target bundleno = 2 (0x2), region = 73 }

// kernel: gpt_forward.13
= control target key start
LH: loop header
LB: loop body
LE: loop exit
PB: predicated region body
PF: predicated region fallthrough
CT: control target
= control target key end

     0   :  { %vm26_vm0 = vcmask 254976   ;;  %s226_s0 = inlined_call_operand.vmem [shape: f32[2,32], index: 0, kind: input, shape index: {}]   ;;  %s227_s1 = inlined_call_operand.vmem [shape: f32[1,32], index: 1, kind: input, shape index: {}]   ;;  %s228_s2 = inlined_call_operand.vmem [shape: f32[1,32], index: 2, kind: input, shape index: {}]   ;;  %s229_s3 = inlined_call_operand.vmem [shape: bf16[32,64], index: 3, kind: input, shape index: {}]   ;;  %s230_s4 = inlined_call_operand.hbm [shape: f32[2,64], index: 4, kind: output, shape index: {}]  }
   0x1   :  { %v23_v0 = vld [vmem:[%s226_s0] sm:$0x3] }
   0x2   :  { %v27_v1 = vsel %vm26_vm0, %v23_v0, 0.0 }
   0x3   :  { %28 = vadd.xlane.f32.xlu0 %v27_v1 }
   0x4   :  { %9 = vsyncpa [#allocation4], 0  ;;  %v154_v7 = vld [vmem:[%s229_s3 + $0x8] sm:$0xff]   ;;  %v180_v8 = vmov 0.0   ;;  %v155_v9 = vld [vmem:[%s229_s3] sm:$0xff]   ;;  %vm181_vm1 = vmmov 0  }
   0x5   :  { %143 = vmatprep.subr.bf16.mxu0 %v180_v8  ;;  %147 = vmatprep.mubr.msk.bf16.mxu0 %vm181_vm1, %v180_v8  ;;  %v135_v14 = vld [vmem:[%s227_s1] ss:$0 sm:$0xff]  ;;  %vm56_vm2 = vcmask 253952   ;;  %vm75_vm3 = vcmask 261120   ;;  %s182_s3 = smov [#allocation3]   ;;  %vm119_vm4 = vcmask 517120  }
   0x6   :  { %144 = vmatpush3.bf16.msra.mxu0 %v154_v7  ;;  %v136_v16 = vld [vmem:[%s228_s2] ss:$0 sm:$0xff]  ;;  %s127_s24 = sshll.u32 %s182_s3, 4  ;;  %s128_s24 = int_to_ptr.vmem [resolvable:$true] %s127_s24 }
   0x7   :  { %145 = vmatprep.subr.bf16.mxu0 %v180_v8  ;;  %s158_s1 = scalar_lea.vmem %s128_s24, 32  ;;  %p163_p1 = scmp.lt.s32.totalorder %s128_s24, %s128_s24 }
   0x8   :  { %p159_p0 = scmp.ne.s32.totalorder %s128_s24, %s158_s1  ;;  %p164_p2 = scmp.lt.s32.totalorder %s158_s1, %s158_s1 }
   0xa   :  { %146 = vmatpush3.bf16.msra.mxu0 %v155_v9  ;;  %p165_p3 = por %p164_p2, %p163_p1 }
   0xc   :  { %p166_p4 = pnand %p165_p3, %p159_p0 }
  0x8c   :  { %v29_v2 = vpop.xlane.xlu0 %28 }
  0x8d   :  { %v31_v3 = vmul.f32 0.03125, %v29_v2 }
  0x8f   :  { %v32_v4 = vsub.f32 %v23_v0, %v31_v3 }
  0x91   :  { %v33_v5 = vmul.f32 %v32_v4, %v32_v4 }
  0x93   :  { %v34_v6 = vsel %vm26_vm0, %v33_v5, 0.0 }
  0x94   :  { %35 = vadd.xlane.f32.xlu0 %v34_v6 }
 0x11d   :  { %v36_v10 = vpop.xlane.xlu0 %35 }
 0x11e   :  { %v37_v11 = vmul.f32 0.03125, %v36_v10 }
 0x120   :  { %v38_v12 = vadd.f32 1e-05, %v37_v11 }
 0x122   :  { %156 = vrsqrt.f32 %v38_v12 }
 0x12f   :  { %v157_v13 = vpop.eup %156 }
 0x130   :  { %v40_v15 = vmul.f32 %v157_v13, %v32_v4 }
 0x132   :  { %v47_v17 = vmul.f32 %v135_v14, %v40_v15 }
 0x134   :  { %v54_v18 = vadd.f32 %v136_v16, %v47_v17 }
 0x136   :  { %v55_v19 = vpack.c.bf16 %v54_v18, %v54_v18 }
 0x138   :  { %57 = vst.msk [vmem:[#allocation2] sm:$0x1] %vm56_vm2, %v55_v19 }
 0x13f   :  { %v58_v20 = vld [vmem:[#allocation2] sm:$0x1] }
 0x140   :  { %148 = vmatmul.mubr.msk.bf16.vlgmr.msra.gmra.mxu0 %vm75_vm3, %v58_v20 }
 0x200   :  { %v113_v21 = vpop.f32.mrf.mxu0 }
 0x201   :  { %120 = vst.msk [vmem:[#allocation3] sm:$0x3] %vm119_vm4, %v113_v21 }
 0x202   :  { %v149_v22 = vpop.f32.mrf.mxu0 }
 0x203   :  { %169 = shalt.err (!%p166_p4)
}
 0x204   :  { %130 = dma.vmem_to_hbm [thread:$0]  %s128_s24, 32, %s230_s4, [#allocation4]   ;;  %v116_v23 = vpop.f32.mrf.mxu0 }
 0x206   :  { %v150_v24 = vpop.f32.mrf.mxu0 }
 0x207   :  { %178 = dma.done.wait [#allocation4], 32  }
 0x208   :  { %179 = vsyncadd [#allocation4], 4294967264 }
 0x209   :  { %134 = vsyncpa [#allocation4], 1 }

// kernel: gpt_forward.9
= control target key start
LH: loop header
LB: loop body
LE: loop exit
PB: predicated region body
PF: predicated region fallthrough
CT: control target
= control target key end

     0   :  { %vm45_vm0 = vcmask 1043456   ;;  %v675_v0 = vmov 0.0   ;;  %vm676_vm1 = vmmov 0   ;;  %vm41_vm2 = vcmask 64512   ;;  %s838_s2 = inlined_call_operand.vmem [shape: bf16[4,8,32], index: 2, kind: input, shape index: {}]   ;;  %s839_s1 = inlined_call_operand.vmem [shape: bf16[4,16,8], index: 1, kind: input, shape index: {}]   ;;  %s840_s0 = inlined_call_operand.vmem [shape: f32[16,32], index: 0, kind: input, shape index: {}]   ;;  %s841_s5 = inlined_call_operand.vmem [shape: bf16[32,128], index: 5, kind: input, shape index: {}]   ;;  %s842_s3 = inlined_call_operand.vmem [shape: f32[1,32], index: 3, kind: input, shape index: {}]   ;;  %s843_s4 = inlined_call_operand.vmem [shape: f32[1,32], index: 4, kind: input, shape index: {}]   ;;  %s844_s6 = inlined_call_operand.vmem [shape: bf16[128,32], index: 6, kind: input, shape index: {}]   ;;  %s845_s7 = inlined_call_operand.vmem [shape: f32[16,32], index: 7, kind: output, shape index: {}]  }
   0x1   :  { %598 = vmatprep.subr.bf16.mxu0 %v675_v0  ;;  %v35_v1 = vld [vmem:[%s838_s2] sm:$0xf]  ;;  %600 = vmatprep.mubr.msk.bf16.mxu0 %vm676_vm1, %v675_v0  ;;  %v547_v4 = vld [vmem:[%s838_s2 + $0x4] sm:$0xf]  ;;  %v557_v6 = vld [vmem:[%s838_s2 + $0xc] sm:$0xf] }
   0x2   :  { %v47_v2 = vsel %vm45_vm0, %v35_v1, 0  ;;  %v652_v3 = vld [vmem:[%s839_s1] sm:$0xff]   ;;  %616 = vmatprep.subr.bf16.mxu1 %v675_v0  ;;  %618 = vmatprep.mubr.msk.bf16.mxu1 %vm676_vm1, %v675_v0  ;;  %v106_v5 = vsel %vm45_vm0, %v547_v4, 0  ;;  %v224_v7 = vsel %vm45_vm0, %v557_v6, 0  ;;  %v654_v8 = vld [vmem:[%s839_s1 + $0x18] sm:$0xff]   ;;  %v653_v10 = vld [vmem:[%s839_s1 + $0x8] sm:$0xff]  }
   0x3   :  { %599 = vmatpush3.bf16.msra.mxu0 %v47_v2  ;;  %617 = vmatpush3.bf16.msra.mxu1 %v224_v7  ;;  %v552_v9 = vld [vmem:[%s838_s2 + $0x8] sm:$0xf]  ;;  %v655_v12 = vld [vmem:[%s839_s1 + $0x10] sm:$0xff]   ;;  %vm269_vm3 = vcmask 261120   ;;  %v31_v22 = vld [vmem:[%s840_s0] sm:$0xff]  ;;  %vm325_vm4 = vcmask 257024  }
   0x4   :  { %604 = vmatprep.subr.bf16.mxu0 %v675_v0  ;;  %630 = vmatprep.subr.bf16.mxu1 %v675_v0  ;;  %v165_v11 = vsel %vm45_vm0, %v552_v9, 0  ;;  %328 = vst.msk [vmem:[#allocation4] sm:$0xff] %vm269_vm3, %v675_v0  ;;  %329 = vst.msk [vmem:[#allocation4 + $0x8] sm:$0xff] %vm269_vm3, %v675_v0  ;;  %v32_v26 = vld [vmem:[%s840_s0 + $0x8] sm:$0xff]  ;;  %v657_v52 = vld [vmem:[%s841_s5] sm:$0xff]  }
   0x5   :  { %v656_v51 = vld [vmem:[%s841_s5 + $0x8] sm:$0xff]   ;;  %v560_v60 = vld [vmem:[%s842_s3] ss:$0 sm:$0xff]  ;;  %v659_v9 = vld [vmem:[%s844_s6 + $0x38] sm:$0xff]  }
   0x6   :  { %601 = vmatmul.mubr.msk.bf16.vlgmr.msra.gmra.mxu0 %vm41_vm2, %v652_v3  ;;  %619 = vmatmul.mubr.msk.bf16.vlgmr.msra.gmra.mxu1 %vm41_vm2, %v654_v8  ;;  %v561_v62 = vld [vmem:[%s843_s4] ss:$0 sm:$0xff] }
   0x7   :  { %605 = vmatpush3.bf16.msra.mxu0 %v106_v5  ;;  %606 = vmatprep.mubr.msk.bf16.mxu0 %vm676_vm1, %v675_v0 }
   0x8   :  { %610 = vmatprep.subr.bf16.mxu0 %v675_v0  ;;  %646 = vmatprep.mubr.msk.bf16.mxu1 %vm676_vm1, %v675_v0 }
   0x9   :  { %631 = vmatpush3.bf16.msra.mxu1 %v659_v9 }
   0xa   :  { %632 = vmatprep.subr.bf16.mxu1 %v675_v0 }
   0xe   :  { %607 = vmatmul.mubr.msk.bf16.vlgmr.msra.gmra.mxu0 %vm41_vm2, %v653_v10  ;;  %v660_v10 = vld [vmem:[%s844_s6 + $0x30] sm:$0xff]  }
   0xf   :  { %611 = vmatpush3.bf16.msra.mxu0 %v165_v11  ;;  %612 = vmatprep.mubr.msk.bf16.mxu0 %vm676_vm1, %v675_v0  ;;  %v661_v11 = vld [vmem:[%s844_s6 + $0x28] sm:$0xff]  }
  0x10   :  { %622 = vmatprep.subr.bf16.mxu0 %v675_v0  ;;  %633 = vmatpush3.bf16.msra.mxu1 %v660_v10 }
  0x11   :  { %634 = vmatprep.subr.bf16.mxu1 %v675_v0 }
  0x14   :  { %635 = vmatpush3.bf16.msra.mxu1 %v661_v11 }
  0x15   :  { %636 = vmatprep.subr.bf16.mxu1 %v675_v0 }
  0x16   :  { %613 = vmatmul.mubr.msk.bf16.vlgmr.msra.gmra.mxu0 %vm41_vm2, %v655_v12  ;;  %v662_v12 = vld [vmem:[%s844_s6 + $0x20] sm:$0xff]  }
  0x17   :  { %626 = vmatprep.mubr.msk.bf16.mxu0 %vm676_vm1, %v675_v0  ;;  %623 = vmatpush3.bf16.msra.mxu0 %v656_v51 }
  0x18   :  { %624 = vmatprep.subr.bf16.mxu0 %v675_v0  ;;  %637 = vmatpush3.bf16.msra.mxu1 %v662_v12 }
  0x19   :  { %638 = vmatprep.subr.bf16.mxu1 %v675_v0 }
  0x1b   :  { %625 = vmatpush3.bf16.msra.mxu0 %v657_v52 }
  0xc6   :  { %v83_v13 = vpop.f32.mrf.mxu0  ;;  %v260_v15 = vpop.f32.mrf.mxu1 }
  0xc7   :  { %v90_v25 = vadd.f32 %v83_v13, %v31_v22  ;;  %v663_v13 = vld [vmem:[%s844_s6 + $0x18] sm:$0xff]  }
  0xc8   :  { %v602_v14 = vpop.f32.mrf.mxu0  ;;  %v620_v17 = vpop.f32.mrf.mxu1  ;;  %639 = vmatpush3.bf16.msra.mxu1 %v663_v13 }
  0xc9   :  { %640 = vmatprep.subr.bf16.mxu1 %v675_v0  ;;  %v664_v14 = vld [vmem:[%s844_s6 + $0x10] sm:$0xff]  }
  0xca   :  { %v86_v16 = vpop.f32.mrf.mxu0  ;;  %v263_v19 = vpop.f32.mrf.mxu1 }
  0xcb   :  { %v91_v30 = vadd.f32 %v86_v16, %v32_v26  ;;  %v666_v16 = vld [vmem:[%s844_s6] sm:$0xff]  }
  0xcc   :  { %v603_v18 = vpop.f32.mrf.mxu0  ;;  %v621_v21 = vpop.f32.mrf.mxu1  ;;  %641 = vmatpush3.bf16.msra.mxu1 %v664_v14 }
  0xcd   :  { %642 = vmatprep.subr.bf16.mxu1 %v675_v0 }
  0xce   :  { %v142_v20 = vpop.f32.mrf.mxu0 }
  0xcf   :  { %v149_v28 = vadd.f32 %v142_v20, %v90_v25 }
  0xd0   :  { %v608_v23 = vpop.f32.mrf.mxu0 }
  0xd2   :  { %v145_v24 = vpop.f32.mrf.mxu0 }
  0xd3   :  { %v150_v33 = vadd.f32 %v145_v24, %v91_v30 }
  0xd4   :  { %v609_v27 = vpop.f32.mrf.mxu0 }
  0xd6   :  { %v201_v29 = vpop.f32.mrf.mxu0 }
  0xd7   :  { %v208_v31 = vadd.f32 %v201_v29, %v149_v28 }
  0xd8   :  { %v614_v32 = vpop.f32.mrf.mxu0 }
  0xd9   :  { %v267_v34 = vadd.f32 %v260_v15, %v208_v31  ;;  %v665_v15 = vld [vmem:[%s844_s6 + $0x8] sm:$0xff]  }
  0xda   :  { %v204_v35 = vpop.f32.mrf.mxu0  ;;  %643 = vmatpush3.bf16.msra.mxu1 %v665_v15 }
  0xdb   :  { %270 = vst.msk [vmem:[#allocation2] sm:$0xff] %vm269_vm3, %v267_v34  ;;  %v209_v36 = vadd.f32 %v204_v35, %v150_v33  ;;  %v274_v37 = vsel %vm269_vm3, %v267_v34, 0.0  ;;  %644 = vmatprep.subr.bf16.mxu1 %v675_v0 }
  0xdc   :  { %v615_v38 = vpop.f32.mrf.mxu0  ;;  %275 = vadd.xlane.f32.xlu0 %v274_v37 }
  0xdd   :  { %v268_v39 = vadd.f32 %v263_v19, %v209_v36 }
  0xde   :  { %645 = vmatpush3.bf16.msra.mxu1 %v666_v16 }
  0xdf   :  { %271 = vst.msk [vmem:[#allocation2 + $0x8] sm:$0xff] %vm269_vm3, %v268_v39  ;;  %v277_v40 = vsel %vm269_vm3, %v268_v39, 0.0 }
  0xe0   :  { %278 = vadd.xlane.f32.xlu0 %v277_v40 }
 0x165   :  { %v276_v41 = vpop.xlane.xlu0 %275 }
 0x166   :  { %v281_v42 = vmul.f32 0.03125, %v276_v41 }
 0x168   :  { %v283_v43 = vsub.f32 %v267_v34, %v281_v42 }
 0x169   :  { %v279_v44 = vpop.xlane.xlu0 %278 }
 0x16a   :  { %v282_v45 = vmul.f32 0.03125, %v279_v44  ;;  %v285_v46 = vmul.f32 %v283_v43, %v283_v43 }
 0x16c   :  { %v284_v47 = vsub.f32 %v268_v39, %v282_v45  ;;  %v287_v48 = vsel %vm269_vm3, %v285_v46, 0.0  ;;  %v416_v39 = vld [vmem:[#allocation4] sm:$0xff] }
 0x16d   :  { %288 = vadd.xlane.f32.xlu1 %v287_v48 }
 0x16e   :  { %v286_v49 = vmul.f32 %v284_v47, %v284_v47 }
 0x170   :  { %v290_v50 = vsel %vm269_vm3, %v286_v49, 0.0 }
 0x171   :  { %291 = vadd.xlane.f32.xlu1 %v290_v50  ;;  %v532_v50 = vld [vmem:[#allocation2 + $0x8] sm:$0xff] }
 0x1f6   :  { %v289_v53 = vpop.xlane.xlu1 %288 }
 0x1f7   :  { %v293_v54 = vmul.f32 0.03125, %v289_v53 }
 0x1f9   :  { %v295_v55 = vadd.f32 1e-05, %v293_v54 }
 0x1fa   :  { %v292_v56 = vpop.xlane.xlu1 %291 }
 0x1fb   :  { %667 = vrsqrt.f32 %v295_v55  ;;  %v294_v57 = vmul.f32 0.03125, %v292_v56 }
 0x1fd   :  { %v296_v58 = vadd.f32 1e-05, %v294_v57 }
 0x1ff   :  { %669 = vrsqrt.f32 %v296_v58 }
 0x208   :  { %v668_v59 = vpop.eup %667 }
 0x209   :  { %v299_v61 = vmul.f32 %v668_v59, %v283_v43  ;;  %v417_v43 = vld [vmem:[#allocation4 + $0x8] sm:$0xff] }
 0x20b   :  { %v307_v63 = vmul.f32 %v560_v60, %v299_v61 }
 0x20c   :  { %v670_v1 = vpop.eup %669 }
 0x20d   :  { %v315_v2 = vadd.f32 %v561_v62, %v307_v63  ;;  %v300_v3 = vmul.f32 %v670_v1, %v284_v47  ;;  %v531_v47 = vld [vmem:[#allocation2] sm:$0xff] }
 0x20f   :  { %v576_v4 = vpack.c.bf16 %v315_v2, %v315_v2  ;;  %v308_v5 = vmul.f32 %v560_v60, %v300_v3 }
 0x211   :  { %326 = vst.msk [vmem:[#allocation3] sm:$0xf] %vm325_vm4, %v576_v4  ;;  %v316_v6 = vadd.f32 %v561_v62, %v308_v5 }
 0x213   :  { %v577_v7 = vpack.c.bf16 %v316_v6, %v316_v6 }
 0x215   :  { %327 = vst.msk [vmem:[#allocation3 + $0x4] sm:$0xf] %vm325_vm4, %v577_v7 }
 0x21c   :  { %v658_v8 = vld [vmem:[#allocation3] sm:$0xff]  }
 0x21d   :  { %627 = vmatmul.mubr.msk.bf16.vlgmr.msra.gmra.mxu0 %vm269_vm3, %v658_v8 }
 0x2dd   :  { %v391_v17 = vpop.f32.mrf.mxu0 }
 0x2de   :  { %v398_v18 = vmul.f32 %v391_v17, %v391_v17 }
 0x2df   :  { %v628_v19 = vpop.f32.mrf.mxu0 }
 0x2e0   :  { %v400_v20 = vmul.f32 %v398_v18, %v391_v17 }
 0x2e1   :  { %v394_v21 = vpop.f32.mrf.mxu0 }
 0x2e2   :  { %v402_v22 = vmul.f32 0.044715, %v400_v20  ;;  %v399_v23 = vmul.f32 %v394_v21, %v394_v21 }
 0x2e3   :  { %v629_v24 = vpop.f32.mrf.mxu0 }
 0x2e4   :  { %v404_v25 = vadd.f32 %v402_v22, %v391_v17  ;;  %v401_v26 = vmul.f32 %v399_v23, %v394_v21 }
 0x2e6   :  { %v406_v27 = vmul.f32 0.7978846, %v404_v25  ;;  %v403_v28 = vmul.f32 0.044715, %v401_v26 }
 0x2e8   :  { %671 = vtanh.f32 %v406_v27  ;;  %v405_v29 = vadd.f32 %v403_v28, %v394_v21 }
 0x2ea   :  { %v407_v0 = vmul.f32 0.7978846, %v405_v29 }
 0x2ec   :  { %673 = vtanh.f32 %v407_v0 }
 0x2f5   :  { %v672_v30 = vpop.eup %671 }
 0x2f6   :  { %v410_v31 = vadd.f32 1.0, %v672_v30 }
 0x2f8   :  { %v412_v33 = vmul.f32 0.5, %v410_v31 }
 0x2f9   :  { %v674_v32 = vpop.eup %673 }
 0x2fa   :  { %v411_v34 = vadd.f32 1.0, %v674_v32  ;;  %v414_v36 = vmul.f32 %v412_v33, %v391_v17 }
 0x2fc   :  { %v413_v35 = vmul.f32 0.5, %v411_v34 }
 0x2fe   :  { %v415_v37 = vmul.f32 %v413_v35, %v394_v21 }
 0x300   :  { %v418_v38 = vpack.c.bf16 %v415_v37, %v414_v36 }
 0x302   :  { %647 = vmatmul.mubr.bf16.vlgmr.msra.gmra.mxu1 %v418_v38 }
 0x3c2   :  { %v517_v40 = vpop.f32.mrf.mxu1 }
 0x3c3   :  { %v524_v41 = vadd.f32 %v517_v40, %v416_v39 }
 0x3c4   :  { %v648_v42 = vpop.f32.mrf.mxu1 }
 0x3c5   :  { %526 = vst.msk [vmem:[#allocation4] sm:$0xff] %vm269_vm3, %v524_v41 }
 0x3c6   :  { %v520_v44 = vpop.f32.mrf.mxu1 }
 0x3c7   :  { %v525_v45 = vadd.f32 %v520_v44, %v417_v43 }
 0x3c8   :  { %v649_v46 = vpop.f32.mrf.mxu1 }
 0x3c9   :  { %527 = vst.msk [vmem:[#allocation4 + $0x8] sm:$0xff] %vm269_vm3, %v525_v45 }
 0x3cc   :  { %v533_v48 = vld [vmem:[#allocation4] sm:$0xff] }
 0x3cd   :  { %v535_v49 = vadd.f32 %v533_v48, %v531_v47 }
 0x3cf   :  { %537 = vst.msk [vmem:[%s845_s7] sm:$0xff] %vm269_vm3, %v535_v49 }
 0x3d0   :  { %v534_v51 = vld [vmem:[#allocation4 + $0x8] sm:$0xff] }
 0x3d1   :  { %v536_v52 = vadd.f32 %v534_v51, %v532_v50 }
 0x3d3   :  { %538 = vst.msk [vmem:[%s845_s7 + $0x8] sm:$0xff] %vm269_vm3, %v536_v52 }

</bundles_post_ra>
